<compile_context>
chip_gen: v7x
topology: tpu7x:2x2x1
jax: 0.10.0
libtpu: 0.0.40
codegen_flags: <defaults>
</compile_context>

<pallas_src>
import math

import jax
import jax.numpy as jnp
from jax import lax
from jax.experimental import pallas as pl
from jax.experimental.pallas import tpu as pltpu

SCALE = 30.0          # EncLayer / MPNNLayer "scale"
LN_EPS = 1e-5         # nn.LayerNorm default
N_RBF = 16
N_POS_EMB = 16
MAX_REL = 32

ROW_TILE_NODE = 256   # residues per grid step (node / edge-update / decoder / torsion kernels)
ROW_TILE_EDGE = 2048  # flattened edge rows per grid step (edge-embed kernel)
VMEM_LIMIT_BYTES = 40 * 1024 * 1024   # fits v7x 64 MiB physical; plenty of slack on v5e/v6e

BF16 = jnp.bfloat16


# ----------------------------------------------------------------------------- helpers
def _probe_erf():
    """Resolve once, eagerly, at import time (outside any jit trace) whether lax.erf
    lowers on this Pallas/Mosaic build (exact torch-GELU vs tanh approximation)."""
    try:
        def _k(x_ref, o_ref):
            o_ref[...] = lax.erf(x_ref[...])
        y = pl.pallas_call(_k, out_shape=jax.ShapeDtypeStruct((8, 128), jnp.float32))(
            jnp.zeros((8, 128), jnp.float32))
        jax.block_until_ready(y)
        return True
    except Exception:
        return False


_GELU_EXACT = _probe_erf()


def _gelu(x):
    if _GELU_EXACT:
        # exact erf-GELU, matching torch.nn.GELU() default
        return 0.5 * x * (1.0 + lax.erf(x * (1.0 / math.sqrt(2.0))))
    # TODO(synk): exact erf-GELU not lowerable on this Pallas build; tanh approximation fallback.
    return jax.nn.gelu(x, approximate=True)


def _layernorm(x, g, b, eps=LN_EPS):
    mu = jnp.mean(x, axis=-1, keepdims=True)
    var = jnp.mean((x - mu) ** 2, axis=-1, keepdims=True)
    return (x - mu) * lax.rsqrt(var + eps) * g + b


def _bdot(a, b):
    """MXU matmul: activation cast to bf16, weight already bf16, f32 accumulation."""
    return jnp.dot(a.astype(BF16), b, preferred_element_type=jnp.float32)


def _gather_rows(hV_full, eidx, tk):
    """One-hot MXU gather of rows of hV_full ([n, H]) selected by eidx ([TK, 1] int32).
    OOB-safe (an out-of-range index produces a zero row), so grid-edge padding rows are
    harmless.  TODO(synk): for very large n this over-spends MXU flops/VMEM; switch to a
    jnp.take / DMA gather once a robust Mosaic lowering is guaranteed."""
    n = hV_full.shape[0]
    iota = lax.broadcasted_iota(jnp.int32, (tk, n), 1)
    onehot = (iota == eidx).astype(jnp.float32).astype(BF16)
    return jnp.dot(onehot, hV_full.astype(BF16), preferred_element_type=jnp.float32)


# ----------------------------------------------------------------------------- kernels
def _node_update_core(hV, hV_full, hE2, eidx, mask, matt,
                      W1v, W1en, b1, W2, b2, W3, b3, g1, be1,
                      Wi, bi, Wo, bo, g2, be2):
    """EncLayer node half == MPNNLayer (inference).  hE2 is the flattened [T*K, H] edge
    block, eidx the matching [T*K, 1] neighbor indices; matt is None on the decoder path.
    Neighbor features are gathered in-kernel from the whole-protein h_V slab."""
    T, H = hV.shape
    TK = hE2.shape[0]
    K = TK // T

    hN = _gather_rows(hV_full, eidx, TK)                                  # [TK, H] f32
    hEN = jnp.concatenate([hE2.astype(BF16), hN.astype(BF16)], axis=-1)   # [TK, 2H] bf16
    mv = _bdot(hV, W1v)                                                   # [T, H] (h_V_expand term)
    pre = (jnp.dot(hEN, W1en, preferred_element_type=jnp.float32) + b1    # single 2H-deep contraction
           ).reshape(T, K, H) + mv[:, None, :]
    m = _gelu(pre).reshape(TK, H)
    m = _gelu(_bdot(m, W2) + b2)
    m = _bdot(m, W3) + b3                                                 # [TK, H]
    if matt is not None:
        m = m * matt                                                      # [TK, 1] attend mask
    dh = jnp.sum(m.reshape(T, K, H), axis=1) * (1.0 / SCALE)              # [T, H]
    x = _layernorm(hV + dh, g1, be1)
    ff = _gelu(_bdot(x, Wi) + bi)
    ff = _bdot(ff, Wo) + bo
    x = _layernorm(x + ff, g2, be2)
    return x * mask


def _enc_node_kernel(hV_ref, hVf_ref, hE_ref, eidx_ref, mask_ref, matt_ref,
                     W1v_ref, W1en_ref, b1_ref, W2_ref, b2_ref, W3_ref, b3_ref,
                     g1_ref, be1_ref, Wi_ref, bi_ref, Wo_ref, bo_ref,
                     g2_ref, be2_ref, out_ref):
    out_ref[0] = _node_update_core(
        hV_ref[0], hVf_ref[0], hE_ref[0], eidx_ref[0], mask_ref[0], matt_ref[0],
        W1v_ref[...], W1en_ref[...], b1_ref[...], W2_ref[...], b2_ref[...],
        W3_ref[...], b3_ref[...], g1_ref[...], be1_ref[...],
        Wi_ref[...], bi_ref[...], Wo_ref[...], bo_ref[...],
        g2_ref[...], be2_ref[...])


def _dec_node_kernel(hV_ref, hVf_ref, hE_ref, eidx_ref, mask_ref,
                     W1v_ref, W1en_ref, b1_ref, W2_ref, b2_ref, W3_ref, b3_ref,
                     g1_ref, be1_ref, Wi_ref, bi_ref, Wo_ref, bo_ref,
                     g2_ref, be2_ref, out_ref):
    # decoder: mask_attend is None in the reference -> no ones-tensor DMA / multiply
    out_ref[0] = _node_update_core(
        hV_ref[0], hVf_ref[0], hE_ref[0], eidx_ref[0], mask_ref[0], None,
        W1v_ref[...], W1en_ref[...], b1_ref[...], W2_ref[...], b2_ref[...],
        W3_ref[...], b3_ref[...], g1_ref[...], be1_ref[...],
        Wi_ref[...], bi_ref[...], Wo_ref[...], bo_ref[...],
        g2_ref[...], be2_ref[...])


def _edge_update_kernel(hV_ref, hVf_ref, hE_ref, eidx_ref,
                        W11v_ref, W11en_ref, b11_ref, W12_ref, b12_ref,
                        W13_ref, b13_ref, g3_ref, be3_ref, out_ref):
    """EncLayer edge half (uses the updated h_V), with in-kernel neighbor gather."""
    hV = hV_ref[0]
    hE2 = hE_ref[0]
    T, H = hV.shape
    TK = hE2.shape[0]
    K = TK // T

    hN = _gather_rows(hVf_ref[0], eidx_ref[0], TK)
    hEN = jnp.concatenate([hE2.astype(BF16), hN.astype(BF16)], axis=-1)
    mv = _bdot(hV, W11v_ref[...])
    pre = (jnp.dot(hEN, W11en_ref[...], preferred_element_type=jnp.float32) + b11_ref[...]
           ).reshape(T, K, H) + mv[:, None, :]
    m = _gelu(pre).reshape(TK, H)
    m = _gelu(_bdot(m, W12_ref[...]) + b12_ref[...])
    m = _bdot(m, W13_ref[...]) + b13_ref[...]
    out_ref[0] = _layernorm(hE2 + m, g3_ref[...], be3_ref[...])


def _edge_embed_kernel(dpos_ref, d25_ref, Rsc_ref, musc_ref, Wp_ref, bp_ref,
                       Wrbf_ref, g_ref, b_ref, We_ref, be_ref, out_ref):
    """Fused positional one-hot + (PositionalEncodings.linear folded into edge_embedding)
    + in-kernel RBF + norm_edges + W_e.  Only 1 int32 + 25 f32 per edge come from HBM."""
    dpos = dpos_ref[0]                    # [T, 1]  int32 relative-position code
    d25 = d25_ref[0]                      # [T, 25] raw neighbor distances (f32)
    T = d25.shape[0]
    n_pos = Wp_ref.shape[0]               # 66

    lane = lax.broadcasted_iota(jnp.int32, (T, n_pos), 1)
    oh = (lane == dpos).astype(jnp.float32).astype(BF16)                 # [T, 66]

    # RBF built in-kernel (kept f32 for feature accuracy): z[:, i*16+j] = (d_i - mu_j)/sigma
    z = jnp.dot(d25, Rsc_ref[...], preferred_element_type=jnp.float32) - musc_ref[...]
    rbf = jnp.exp(-(z * z))                                              # [T, 400]

    e = (jnp.dot(oh, Wp_ref[...], preferred_element_type=jnp.float32)    # fused positional term
         + _bdot(rbf, Wrbf_ref[...]) + bp_ref[...])                      # [T, H]
    e = _layernorm(e, g_ref[...], b_ref[...])
    out_ref[0] = _bdot(e, We_ref[...]) + be_ref[...]                     # W_e


def _torsion_kernel(hV_ref, Wt_ref, bt_ref, out_ref):
    # W_torsions columns padded to a 128-lane multiple -> unmasked (lane-dense) stores
    out_ref[0] = _bdot(hV_ref[0], Wt_ref[...]) + bt_ref[...]


# ----------------------------------------------------------------------------- pallas_call wrapper
def _node_row_tile(n_nodes, k_nb):
    # cap TR so the in-kernel one-hot gather matrix ([TR*K, N] bf16) stays within ~8 MiB
    budget_rows = (8 * 1024 * 1024) // max(1, 2 * k_nb * n_nodes)
    return int(max(8, min(ROW_TILE_NODE, (budget_rows // 8) * 8)))


def _call_graph(kernel, inputs, out_shape, out_mode, n_nodes, k_nb, row_tile):
    """Grid = (batch, node-row tiles), both 'parallel'.
    Input modes: 'node' -> [B, n_nodes, ...] tiled TR rows/step; 'edge' ->
    [B, n_nodes*k_nb, ...] tiled TR*k_nb rows (row-aligned with the node tile);
    'full' -> whole per-batch slab (block index constant over the row axis, so the
    pipeline re-fetches it only when the batch index changes); 'w' -> whole-array weights."""
    B = out_shape[0]
    TR = max(1, min(row_tile, n_nodes))
    if B == 1 and n_nodes > 8:
        # guarantee >= 2 row tiles so a v7x megacore can split the work across both TCs
        TR = min(TR, max(8, (((n_nodes + 1) // 2) + 7) // 8 * 8))
    grid = (B, pl.cdiv(n_nodes, TR))

    def spec(a, mode):
        if mode == "node":
            rest = tuple(a.shape[2:])
            return pl.BlockSpec((1, TR) + rest,
                                lambda b, t, _n=len(rest): (b, t) + (0,) * _n)
        if mode == "edge":
            rest = tuple(a.shape[2:])
            return pl.BlockSpec((1, TR * k_nb) + rest,
                                lambda b, t, _n=len(rest): (b, t) + (0,) * _n)
        if mode == "full":
            rest = tuple(a.shape[1:])
            return pl.BlockSpec((1,) + rest,
                                lambda b, t, _n=len(rest): (b,) + (0,) * _n)
        # weights: whole-array block, fetched once.
        # TODO(synk): pl.Buffered(1) here would halve weight VMEM on v7x; skipped to keep
        #             compatibility with builds that require buffer_count >= 2.
        return pl.BlockSpec(a.shape, lambda b, t, _n=a.ndim: (0,) * _n)

    in_specs = [spec(a, m) for a, m in inputs]
    out_specs = spec(jax.ShapeDtypeStruct(out_shape, jnp.float32), out_mode)
    return pl.pallas_call(
        kernel,
        grid=grid,
        in_specs=in_specs,
        out_specs=out_specs,
        out_shape=jax.ShapeDtypeStruct(out_shape, jnp.float32),
        compiler_params=pltpu.CompilerParams(
            dimension_semantics=("parallel", "parallel"),
            vmem_limit_bytes=VMEM_LIMIT_BYTES),
    )(*[a for a, _ in inputs])


# ----------------------------------------------------------------------------- parameters
def init_params(key, *, H, vocab, num_mix, n_enc, n_dec):
    keys = jax.random.split(key, 512)
    cnt = [0]

    def nk():
        k = keys[cnt[0]]
        cnt[0] += 1
        return k

    def W(i, o):
        return jax.random.normal(nk(), (i, o), jnp.float32) / math.sqrt(i)

    def bvec(o):
        return 0.01 * jax.random.normal(nk(), (1, o), jnp.float32)

    def ln(o):
        return jnp.ones((1, o), jnp.float32), jnp.zeros((1, o), jnp.float32)

    edge_in = N_POS_EMB + N_RBF * 25
    p = {}
    p['W_s'] = 0.1 * jax.random.normal(nk(), (vocab, H), jnp.float32)   # nn.Embedding
    g_e, b_e = ln(H)
    p['edge_feat'] = [W(2 * MAX_REL + 2, N_POS_EMB), bvec(N_POS_EMB),   # PositionalEncodings.linear
                      W(edge_in, H),                                    # edge_embedding (no bias)
                      g_e, b_e,                                         # norm_edges
                      W(H, H), bvec(H)]                                 # W_e

    def node_layer():
        g1, be1 = ln(H)
        g2, be2 = ln(H)
        return [W(3 * H, H), bvec(H), W(H, H), bvec(H), W(H, H), bvec(H),
                g1, be1, W(H, 4 * H), bvec(4 * H), W(4 * H, H), bvec(H), g2, be2]

    def edge_layer():
        g3, be3 = ln(H)
        return [W(3 * H, H), bvec(H), W(H, H), bvec(H), W(H, H), bvec(H), g3, be3]

    p['enc'] = [{'node': node_layer(), 'edge': edge_layer()} for _ in range(n_enc)]
    p['dec'] = [{'node': node_layer()} for _ in range(n_dec)]

    # W_torsions in torch layout [H, 4*3*num_mix]; split happens in the wrapper.
    p['torsion'] = [W(H, 4 * 3 * num_mix), bvec(4 * 3 * num_mix)]
    p['num_mix'] = num_mix
    return p


def _prep_node_weights(lw):
    W1, b1, W2, b2, W3, b3, g1, be1, Wi, bi, Wo, bo, g2, be2 = lw
    H = W2.shape[0]
    bf = lambda w: w.astype(BF16)
    # W1 split: rows [0:H] -> h_V_expand term, rows [H:3H] -> one 2H-deep (h_E | h_N) GEMM
    return [bf(W1[:H]), bf(W1[H:]), b1, bf(W2), b2, bf(W3), b3,
            g1, be1, bf(Wi), bi, bf(Wo), bo, g2, be2]


def _prep_edge_weights(lw):
    W11, b11, W12, b12, W13, b13, g3, be3 = lw
    H = W12.shape[0]
    bf = lambda w: w.astype(BF16)
    return [bf(W11[:H]), bf(W11[H:]), b11, bf(W12), b12, bf(W13), b13, g3, be3]


# ----------------------------------------------------------------------------- forward (JAX glue + kernels)
def gather_nodes_jax(nodes, idx):
    # nodes [B, N, C], idx [B, N, K] -> [B, N, K, C] with nodes[b, idx[b,i,k], :]
    return jax.vmap(lambda n, i: n[i])(nodes, idx)


def struct2seq_forward(params, X, X_m, S, L, mask, chain_M, residue_idx,
                       dihedral_mask, chain_encoding_all, top_k=8):
    f32 = jnp.float32
    X = X.astype(f32)
    mask = mask.astype(f32)
    B, Nres = mask.shape
    H = params['W_s'].shape[1]

    # ---- ProteinFeatures: virtual Cb + backbone atoms
    b = X[:, :, 1, :] - X[:, :, 0, :]
    c = X[:, :, 2, :] - X[:, :, 1, :]
    a = jnp.cross(b, c, axis=-1)
    Cb = -0.58273431 * a + 0.56802827 * b - 0.54067466 * c + X[:, :, 1, :]
    Ca = X[:, :, 1, :]
    Nn = X[:, :, 0, :]
    Cc = X[:, :, 2, :]
    Oo = X[:, :, 4, :]

    # ---- _dist: masked pairwise Ca distances + kNN (top_k_sample=False path)
    mask2d = mask[:, None, :] * mask[:, :, None]
    dX = Ca[:, None, :, :] - Ca[:, :, None, :]
    D = mask2d * jnp.sqrt(jnp.sum(dX * dX, -1) + 1e-6)
    D_max = jnp.max(D, -1, keepdims=True)
    D_adjust = D + (1.0 - mask2d) * D_max
    k = min(top_k, Nres)
    negD, E_idx = lax.top_k(-D_adjust, k)     # NOTE: tie-break order may differ from torch.topk
    D_neighbors = -negD

    def pair_d(A, Bv):
        d = jnp.sqrt(jnp.sum((A[:, :, None, :] - Bv[:, None, :, :]) ** 2, -1) + 1e-6)
        return jnp.take_along_axis(d, E_idx, axis=2)

    pairs = [(Nn, Nn), (Cc, Cc), (Oo, Oo), (Cb, Cb), (Ca, Nn), (Ca, Cc), (Ca, Oo),
             (Ca, Cb), (Nn, Cc), (Nn, Oo), (Nn, Cb), (Cb, Cc), (Cb, Oo), (Oo, Cc),
             (Nn, Ca), (Cc, Ca), (Oo, Ca), (Cb, Ca), (Cc, Nn), (Oo, Nn), (Cb, Nn),
             (Cc, Cb), (Oo, Cb), (Cc, Oo)]
    # Only the 25 raw distances go to HBM; RBF expansion happens in-kernel.
    D25 = jnp.stack([D_neighbors] + [pair_d(A, Bv) for A, Bv in pairs], axis=-1)
    D25 = D25.reshape(B, Nres * k, 25).astype(f32)                       # [B, N*K, 25]

    # ---- positional / chain code: one int32 per edge (one-hot built in-kernel)
    off = residue_idx[:, :, None] - residue_idx[:, None, :]
    off_g = jnp.take_along_axis(off, E_idx, axis=2)
    same_chain = (chain_encoding_all[:, :, None] - chain_encoding_all[:, None, :] == 0
                  ).astype(jnp.int32)
    E_chains = jnp.take_along_axis(same_chain, E_idx, axis=2)
    d_pos = (jnp.clip(off_g + MAX_REL, 0, 2 * MAX_REL) * E_chains
             + (1 - E_chains) * (2 * MAX_REL + 1)).astype(jnp.int32)
    d_pos = d_pos.reshape(B, Nres * k, 1)                                # [B, N*K, 1]

    # ---- tiny constants for the in-kernel RBF: z = d25 @ R_scaled - mu_scaled
    sigma = (22.0 - 2.0) / N_RBF
    mu = jnp.linspace(2.0, 22.0, N_RBF).astype(f32)
    R_scaled = jnp.repeat(jnp.eye(25, dtype=f32), N_RBF, axis=1) / sigma  # [25, 400]
    mu_scaled = (jnp.tile(mu, 25) / sigma)[None, :]                       # [1, 400]

    # ---- fold PositionalEncodings.linear into edge_embedding
    Wp, bp, Wee, g_e, b_e, We, be_w = params['edge_feat']
    Wp_fused = jnp.dot(Wp, Wee[:N_POS_EMB]).astype(BF16)                  # [66, H]
    b_fused = jnp.dot(bp, Wee[:N_POS_EMB])                                # [1, H]
    Wrbf = Wee[N_POS_EMB:].astype(BF16)                                   # [400, H]

    edge_row_tile = max(8, ROW_TILE_EDGE // max(1, k))
    h_E = _call_graph(
        _edge_embed_kernel,
        [(d_pos, "edge"), (D25, "edge"),
         (R_scaled, "w"), (mu_scaled, "w"), (Wp_fused, "w"), (b_fused, "w"),
         (Wrbf, "w"), (g_e, "w"), (b_e, "w"), (We.astype(BF16), "w"), (be_w, "w")],
        (B, Nres * k, H), "edge", Nres, k, edge_row_tile)
    # h_E stays flattened as [B, N*K, H] for all downstream kernels (lane-dense blocks)

    # TODO(synk): side-chain features (E_s -> F, F_idx) computed in the reference forward are
    # dead code w.r.t. Struct2Seq's returned (mean, concentration, mix_logits); omitted here.

    # ---- node init + masks
    h_V = params['W_s'][S]                              # nn.Embedding lookup  [B,N,H]
    mask3 = mask[..., None]                             # [B,N,1]
    mask_attend = (mask3 * gather_nodes_jax(mask3, E_idx)[..., 0]).reshape(B, Nres * k, 1)
    E_idx_flat = E_idx.reshape(B, Nres * k, 1).astype(jnp.int32)

    node_tile = _node_row_tile(Nres, k)

    # ---- encoder layers: neighbor features gathered in-kernel from the h_V slab, so no
    #      [B,N,K,H] gather tensor is ever written/read through HBM per layer.
    for lw in params['enc']:
        nw = _prep_node_weights(lw['node'])
        ew = _prep_edge_weights(lw['edge'])
        h_V = _call_graph(
            _enc_node_kernel,
            [(h_V, "node"), (h_V, "full"), (h_E, "edge"), (E_idx_flat, "edge"),
             (mask3, "node"), (mask_attend, "edge")] + [(w, "w") for w in nw],
            (B, Nres, H), "node", Nres, k, node_tile)
        h_E = _call_graph(
            _edge_update_kernel,
            [(h_V, "node"), (h_V, "full"), (h_E, "edge"), (E_idx_flat, "edge")]
            + [(w, "w") for w in ew],
            (B, Nres * k, H), "edge", Nres, k, node_tile)

    # ---- decoder layers (mask_attend is None on this path in the reference)
    for lw in params['dec']:
        nw = _prep_node_weights(lw['node'])
        h_V = _call_graph(
            _dec_node_kernel,
            [(h_V, "node"), (h_V, "full"), (h_E, "edge"), (E_idx_flat, "edge"),
             (mask3, "node")] + [(w, "w") for w in nw],
            (B, Nres, H), "node", Nres, k, node_tile)

    # ---- torsion head: columns padded to 128 lanes (unmasked stores); split in wrapper
    M = params['num_mix']
    Wt, bt = params['torsion']
    out_dim = 4 * 3 * M
    pad = (-out_dim) % 128
    Wt_p = jnp.pad(Wt, ((0, 0), (0, pad))).astype(BF16)
    bt_p = jnp.pad(bt, ((0, 0), (0, pad)))
    t = _call_graph(_torsion_kernel, [(h_V, "node"), (Wt_p, "w"), (bt_p, "w")],
                    (B, Nres, out_dim + pad), "node", Nres, k, node_tile)
    t = t[..., :out_dim].reshape(B, Nres, 4, M, 3)
    mean = t[..., 0]
    raw = t[..., 1]
    # torch Softplus(beta=1, threshold=20)
    sp = jnp.where(raw > 20.0, raw, jnp.log1p(jnp.exp(jnp.minimum(raw, 20.0))))
    concentration = 0.1 + sp
    mix_logits = t[..., 2]
    return mean, concentration, mix_logits


# ----------------------------------------------------------------------------- main
if __name__ == "__main__":
    H = 128         # node_features == edge_features == hidden_dim (lane-dense last dim)
    NUM_MIX = 6
    VOCAB = 21
    B, Nres, A = 2, 16, 37          # 37 atoms per residue (backbone + 32 side-chain slots)
    K_NEIGH = 8

    key = jax.random.PRNGKey(0)
    kp, kX, kS, kXm = jax.random.split(key, 4)

    params = init_params(kp, H=H, vocab=VOCAB, num_mix=NUM_MIX, n_enc=3, n_dec=3)

    X = 4.0 * jax.random.normal(kX, (B, Nres, A, 3), jnp.float32)
    X_m = (jax.random.uniform(kXm, (B, Nres, A)) > 0.3).astype(jnp.float32)
    S = jax.random.randint(kS, (B, Nres), 0, VOCAB, dtype=jnp.int32)
    L = jnp.array([Nres, Nres - 2], jnp.int32)                       # unused by forward
    mask = jnp.ones((B, Nres), jnp.float32).at[1, -2:].set(0.0)
    chain_M = jnp.ones((B, Nres), jnp.float32)                       # unused by forward
    residue_idx = jnp.broadcast_to(jnp.arange(Nres, dtype=jnp.int32), (B, Nres))
    dihedral_mask = jnp.ones((B, Nres, 4), jnp.float32)              # unused by forward
    chain_enc = jnp.concatenate(
        [jnp.zeros((B, Nres // 2), jnp.int32), jnp.ones((B, Nres - Nres // 2), jnp.int32)],
        axis=1)

    mean, conc, mix_logits = struct2seq_forward(
        params, X, X_m, S, L, mask, chain_M, residue_idx, dihedral_mask, chain_enc,
        top_k=K_NEIGH)
    jax.block_until_ready((mean, conc, mix_logits))

    assert mean.shape == (B, Nres, 4, NUM_MIX) and mean.dtype == jnp.float32
    assert conc.shape == (B, Nres, 4, NUM_MIX) and conc.dtype == jnp.float32
    assert mix_logits.shape == (B, Nres, 4, NUM_MIX) and mix_logits.dtype == jnp.float32
    print("KERNEL_OK")
</pallas_src>

<mosaic_0001>
module attributes {stable_mosaic.version = 11 : i64} {
  func.func @_k(%arg0: memref<8x128xf32, #tpu.memory_space<vmem>>, %arg1: memref<8x128xf32, #tpu.memory_space<vmem>>) attributes {dimension_semantics = [], scalar_prefetch = 0 : i64, scratch_operands = 0 : i64, tpu.core_type = #tpu.core_type<tc>} {
    %c0 = arith.constant 0 : index
    %c0_0 = arith.constant 0 : index
    %0 = vector.load %arg0[%c0, %c0_0] : memref<8x128xf32, #tpu.memory_space<vmem>>, vector<8x128xf32>
    %1 = math.erf %0 : vector<8x128xf32>
    %c0_1 = arith.constant 0 : index
    %c0_2 = arith.constant 0 : index
    %2 = vector.load %arg1[%c0_1, %c0_2] : memref<8x128xf32, #tpu.memory_space<vmem>>, vector<8x128xf32>
    tpu.vector_store %arg1[%c0_1, %c0_2], %1 {strides = array<i32>} : memref<8x128xf32, #tpu.memory_space<vmem>>, vector<8x128xf32>,
    return
  }
}

module attributes {stable_mosaic.version = 11 : i64} {
  func.func @_edge_embed_kernel(%arg0: i32, %arg1: i32, %arg2: memref<1x128x1xi32, #tpu.memory_space<vmem>>, %arg3: memref<1x128x25xf32, #tpu.memory_space<vmem>>, %arg4: memref<25x400xf32, #tpu.memory_space<vmem>>, %arg5: memref<1x400xf32, #tpu.memory_space<vmem>>, %arg6: memref<66x128xbf16, #tpu.memory_space<vmem>>, %arg7: memref<1x128xf32, #tpu.memory_space<vmem>>, %arg8: memref<400x128xbf16, #tpu.memory_space<vmem>>, %arg9: memref<1x128xf32, #tpu.memory_space<vmem>>, %arg10: memref<1x128xf32, #tpu.memory_space<vmem>>, %arg11: memref<128x128xbf16, #tpu.memory_space<vmem>>, %arg12: memref<1x128xf32, #tpu.memory_space<vmem>>, %arg13: memref<1x128x128xf32, #tpu.memory_space<vmem>>) attributes {dimension_semantics = [#tpu.dimension_semantics<parallel>, #tpu.dimension_semantics<parallel>], iteration_bounds = array<i64: 2, 1>, scalar_prefetch = 0 : i64, scratch_operands = 0 : i64, tpu.core_type = #tpu.core_type<tc>, window_params = [{transform_indices = @transform_0, window_bounds = array<i64: 1, 128, 1>}, {transform_indices = @transform_1, window_bounds = array<i64: 1, 128, 25>}, {pipeline_mode = #tpu.pipeline_mode<synchronous>, transform_indices = @transform_2, window_bounds = array<i64: 25, 400>}, {pipeline_mode = #tpu.pipeline_mode<synchronous>, transform_indices = @transform_3, window_bounds = array<i64: 1, 400>}, {pipeline_mode = #tpu.pipeline_mode<synchronous>, transform_indices = @transform_4, window_bounds = array<i64: 66, 128>}, {pipeline_mode = #tpu.pipeline_mode<synchronous>, transform_indices = @transform_5, window_bounds = array<i64: 1, 128>}, {pipeline_mode = #tpu.pipeline_mode<synchronous>, transform_indices = @transform_6, window_bounds = array<i64: 400, 128>}, {pipeline_mode = #tpu.pipeline_mode<synchronous>, transform_indices = @transform_7, window_bounds = array<i64: 1, 128>}, {pipeline_mode = #tpu.pipeline_mode<synchronous>, transform_indices = @transform_8, window_bounds = array<i64: 1, 128>}, {pipeline_mode = #tpu.pipeline_mode<synchronous>, transform_indices = @transform_9, window_bounds = array<i64: 128, 128>}, {pipeline_mode = #tpu.pipeline_mode<synchronous>, transform_indices = @transform_10, window_bounds = array<i64: 1, 128>}, {transform_indices = @transform_11, window_bounds = array<i64: 1, 128, 128>}]} {
    %c0 = arith.constant 0 : index
    %c0_0 = arith.constant 0 : index
    %c0_1 = arith.constant 0 : index
    %0 = vector.load %arg2[%c0, %c0_0, %c0_1] : memref<1x128x1xi32, #tpu.memory_space<vmem>>, vector<1x128x1xi32>
    %1 = vector.shape_cast %0 : vector<1x128x1xi32> to vector<128x1xi32>
    %c0_2 = arith.constant 0 : index
    %c0_3 = arith.constant 0 : index
    %c0_4 = arith.constant 0 : index
    %2 = vector.load %arg3[%c0_2, %c0_3, %c0_4] : memref<1x128x25xf32, #tpu.memory_space<vmem>>, vector<1x128x25xf32>
    %3 = vector.shape_cast %2 : vector<1x128x25xf32> to vector<128x25xf32>
    %4 = tpu.iota {dimensions = array<i32: 1>} : vector<128x66xi32>
    %5 = vector.broadcast %1 : vector<128x1xi32> to vector<128x66xi32>
    %6 = arith.cmpi eq, %4, %5 : vector<128x66xi32>
    %7 = arith.extui %6 : vector<128x66xi1> to vector<128x66xi32>
    %8 = arith.sitofp %7 : vector<128x66xi32> to vector<128x66xf32>
    %9 = arith.truncf %8 : vector<128x66xf32> to vector<128x66xbf16>
    %c0_5 = arith.constant 0 : index
    %c0_6 = arith.constant 0 : index
    %10 = vector.load %arg4[%c0_5, %c0_6] : memref<25x400xf32, #tpu.memory_space<vmem>>, vector<25x400xf32>
    %cst = arith.constant dense<0.000000e+00> : vector<128x400xf32>
    %11 = tpu.matmul %3, %10, %cst {dimension_numbers = #tpu.dot_dimension_numbers<[1], [0], [0], [1], [0, 0, 1, 1], [], []>} : vector<128x25xf32>, vector<25x400xf32>, vector<128x400xf32> -> vector<128x400xf32>
    %c0_7 = arith.constant 0 : index
    %c0_8 = arith.constant 0 : index
    %12 = vector.load %arg5[%c0_7, %c0_8] : memref<1x400xf32, #tpu.memory_space<vmem>>, vector<1x400xf32>
    %13 = vector.broadcast %12 : vector<1x400xf32> to vector<128x400xf32>
    %14 = arith.subf %11, %13 : vector<128x400xf32>
    %15 = arith.mulf %14, %14 : vector<128x400xf32>
    %cst_9 = arith.constant 0.000000e+00 : f32
    %16 = vector.broadcast %cst_9 : f32 to vector<128x400xf32>
    %17 = arith.subf %16, %15 : vector<128x400xf32>
    %18 = math.exp %17 : vector<128x400xf32>
    %c0_10 = arith.constant 0 : index
    %c0_11 = arith.constant 0 : index
    %19 = vector.load %arg6[%c0_10, %c0_11] : memref<66x128xbf16, #tpu.memory_space<vmem>>, vector<66x128xbf16>
    %cst_12 = arith.constant dense<0.000000e+00> : vector<128x128xf32>
    %20 = tpu.matmul %9, %19, %cst_12 {dimension_numbers = #tpu.dot_dimension_numbers<[1], [0], [0], [1], [0, 0, 1, 1], [], []>} : vector<128x66xbf16>, vector<66x128xbf16>, vector<128x128xf32> -> vector<128x128xf32>
    %c0_13 = arith.constant 0 : index
    %c0_14 = arith.constant 0 : index
    %21 = vector.load %arg8[%c0_13, %c0_14] : memref<400x128xbf16, #tpu.memory_space<vmem>>, vector<400x128xbf16>
    %22 = arith.truncf %18 : vector<128x400xf32> to vector<128x400xbf16>
    %cst_15 = arith.constant dense<0.000000e+00> : vector<128x128xf32>
    %23 = tpu.matmul %22, %21, %cst_15 {dimension_numbers = #tpu.dot_dimension_numbers<[1], [0], [0], [1], [0, 0, 1, 1], [], []>} : vector<128x400xbf16>, vector<400x128xbf16>, vector<128x128xf32> -> vector<128x128xf32>
    %24 = arith.addf %20, %23 : vector<128x128xf32>
    %c0_16 = arith.constant 0 : index
    %c0_17 = arith.constant 0 : index
    %25 = vector.load %arg7[%c0_16, %c0_17] : memref<1x128xf32, #tpu.memory_space<vmem>>, vector<1x128xf32>
    %26 = vector.broadcast %25 : vector<1x128xf32> to vector<128x128xf32>
    %27 = arith.addf %24, %26 : vector<128x128xf32>
    %c0_18 = arith.constant 0 : index
    %c0_19 = arith.constant 0 : index
    %28 = vector.load %arg9[%c0_18, %c0_19] : memref<1x128xf32, #tpu.memory_space<vmem>>, vector<1x128xf32>
    %c0_20 = arith.constant 0 : index
    %c0_21 = arith.constant 0 : index
    %29 = vector.load %arg10[%c0_20, %c0_21] : memref<1x128xf32, #tpu.memory_space<vmem>>, vector<1x128xf32>
    %cst_22 = arith.constant dense<0.000000e+00> : vector<128xf32>
    %30 = vector.multi_reduction <add>, %27, %cst_22 [1] : vector<128x128xf32> to vector<128xf32>
    %31 = vector.shape_cast %30 : vector<128xf32> to vector<128x1xf32>
    %cst_23 = arith.constant 1.280000e+02 : f32
    %32 = vector.broadcast %cst_23 : f32 to vector<128x1xf32>
    %33 = arith.divf %31, %32 : vector<128x1xf32>
    %34 = vector.broadcast %33 : vector<128x1xf32> to vector<128x128xf32>
    %35 = arith.subf %27, %34 : vector<128x128xf32>
    %36 = arith.mulf %35, %35 : vector<128x128xf32>
    %cst_24 = arith.constant dense<0.000000e+00> : vector<128xf32>
    %37 = vector.multi_reduction <add>, %36, %cst_24 [1] : vector<128x128xf32> to vector<128xf32>
    %38 = vector.shape_cast %37 : vector<128xf32> to vector<128x1xf32>
    %cst_25 = arith.constant 1.280000e+02 : f32
    %39 = vector.broadcast %cst_25 : f32 to vector<128x1xf32>
    %40 = arith.divf %38, %39 : vector<128x1xf32>
    %41 = vector.broadcast %33 : vector<128x1xf32> to vector<128x128xf32>
    %42 = arith.subf %27, %41 : vector<128x128xf32>
    %cst_26 = arith.constant 9.99999974E-6 : f32
    %43 = vector.broadcast %cst_26 : f32 to vector<128x1xf32>
    %44 = arith.addf %40, %43 : vector<128x1xf32>
    %45 = math.rsqrt %44 : vector<128x1xf32>
    %46 = vector.broadcast %45 : vector<128x1xf32> to vector<128x128xf32>
    %47 = arith.mulf %42, %46 : vector<128x128xf32>
    %48 = vector.broadcast %28 : vector<1x128xf32> to vector<128x128xf32>
    %49 = arith.mulf %47, %48 : vector<128x128xf32>
    %50 = vector.broadcast %29 : vector<1x128xf32> to vector<128x128xf32>
    %51 = arith.addf %49, %50 : vector<128x128xf32>
    %c0_27 = arith.constant 0 : index
    %c0_28 = arith.constant 0 : index
    %52 = vector.load %arg11[%c0_27, %c0_28] : memref<128x128xbf16, #tpu.memory_space<vmem>>, vector<128x128xbf16>
    %53 = arith.truncf %51 : vector<128x128xf32> to vector<128x128xbf16>
    %cst_29 = arith.constant dense<0.000000e+00> : vector<128x128xf32>
    %54 = tpu.matmul %53, %52, %cst_29 {dimension_numbers = #tpu.dot_dimension_numbers<[1], [0], [0], [1], [0, 0, 1, 1], [], []>} : vector<128x128xbf16>, vector<128x128xbf16>, vector<128x128xf32> -> vector<128x128xf32>
    %c0_30 = arith.constant 0 : index
    %c0_31 = arith.constant 0 : index
    %55 = vector.load %arg12[%c0_30, %c0_31] : memref<1x128xf32, #tpu.memory_space<vmem>>, vector<1x128xf32>
    %56 = vector.broadcast %55 : vector<1x128xf32> to vector<128x128xf32>
    %57 = arith.addf %54, %56 : vector<128x128xf32>
    %c0_32 = arith.constant 0 : index
    %c0_33 = arith.constant 0 : index
    %c0_34 = arith.constant 0 : index
    %58 = vector.load %arg13[%c0_32, %c0_33, %c0_34] : memref<1x128x128xf32, #tpu.memory_space<vmem>>, vector<1x128x128xf32>
    %59 = vector.shape_cast %58 : vector<1x128x128xf32> to vector<128x128xf32>
    %60 = vector.shape_cast %57 : vector<128x128xf32> to vector<1x128x128xf32>
    tpu.vector_store %arg13[%c0_32, %c0_33, %c0_34], %60 {strides = array<i32>} : memref<1x128x128xf32, #tpu.memory_space<vmem>>, vector<1x128x128xf32>,
    return
  }
  func.func @transform_0(%arg0: i32, %arg1: i32) -> (i32, i32, i32) {
    %c0_i32 = arith.constant 0 : i32
    %c0_i32_0 = arith.constant 0 : i32
    return %arg0, %arg1, %c0_i32 : i32, i32, i32
  }
  func.func @transform_1(%arg0: i32, %arg1: i32) -> (i32, i32, i32) {
    %c0_i32 = arith.constant 0 : i32
    %c0_i32_0 = arith.constant 0 : i32
    return %arg0, %arg1, %c0_i32 : i32, i32, i32
  }
  func.func @transform_2(%arg0: i32, %arg1: i32) -> (i32, i32) {
    %c0_i32 = arith.constant 0 : i32
    %c0_i32_0 = arith.constant 0 : i32
    %c0_i32_1 = arith.constant 0 : i32
    return %c0_i32, %c0_i32_0 : i32, i32
  }
  func.func @transform_3(%arg0: i32, %arg1: i32) -> (i32, i32) {
    %c0_i32 = arith.constant 0 : i32
    %c0_i32_0 = arith.constant 0 : i32
    %c0_i32_1 = arith.constant 0 : i32
    return %c0_i32, %c0_i32_0 : i32, i32
  }
  func.func @transform_4(%arg0: i32, %arg1: i32) -> (i32, i32) {
    %c0_i32 = arith.constant 0 : i32
    %c0_i32_0 = arith.constant 0 : i32
    %c0_i32_1 = arith.constant 0 : i32
    return %c0_i32, %c0_i32_0 : i32, i32
  }
  func.func @transform_5(%arg0: i32, %arg1: i32) -> (i32, i32) {
    %c0_i32 = arith.constant 0 : i32
    %c0_i32_0 = arith.constant 0 : i32
    %c0_i32_1 = arith.constant 0 : i32
    return %c0_i32, %c0_i32_0 : i32, i32
  }
  func.func @transform_6(%arg0: i32, %arg1: i32) -> (i32, i32) {
    %c0_i32 = arith.constant 0 : i32
    %c0_i32_0 = arith.constant 0 : i32
    %c0_i32_1 = arith.constant 0 : i32
    return %c0_i32, %c0_i32_0 : i32, i32
  }
  func.func @transform_7(%arg0: i32, %arg1: i32) -> (i32, i32) {
    %c0_i32 = arith.constant 0 : i32
    %c0_i32_0 = arith.constant 0 : i32
    %c0_i32_1 = arith.constant 0 : i32
    return %c0_i32, %c0_i32_0 : i32, i32
  }
  func.func @transform_8(%arg0: i32, %arg1: i32) -> (i32, i32) {
    %c0_i32 = arith.constant 0 : i32
    %c0_i32_0 = arith.constant 0 : i32
    %c0_i32_1 = arith.constant 0 : i32
    return %c0_i32, %c0_i32_0 : i32, i32
  }
  func.func @transform_9(%arg0: i32, %arg1: i32) -> (i32, i32) {
    %c0_i32 = arith.constant 0 : i32
    %c0_i32_0 = arith.constant 0 : i32
    %c0_i32_1 = arith.constant 0 : i32
    return %c0_i32, %c0_i32_0 : i32, i32
  }
  func.func @transform_10(%arg0: i32, %arg1: i32) -> (i32, i32) {
    %c0_i32 = arith.constant 0 : i32
    %c0_i32_0 = arith.constant 0 : i32
    %c0_i32_1 = arith.constant 0 : i32
    return %c0_i32, %c0_i32_0 : i32, i32
  }
  func.func @transform_11(%arg0: i32, %arg1: i32) -> (i32, i32, i32) {
    %c0_i32 = arith.constant 0 : i32
    %c0_i32_0 = arith.constant 0 : i32
    return %arg0, %arg1, %c0_i32 : i32, i32, i32
  }
}

</mosaic_0001>

<bundles_post_ra>
// kernel: tpu_custom_call.1
= control target key start
LH: loop header
LB: loop body
LE: loop exit
PB: predicated region body
PF: predicated region fallthrough
CT: control target
= control target key end

     0   :  { %6 = vsyncpa [#allocation3], 0  ;;  %s127_s0 = inlined_call_operand.hbm [shape: f32[8,128], index: 0, kind: input, shape index: {}]   ;;  %s128_s1 = inlined_call_operand.hbm [shape: f32[8,128], index: 1, kind: output, shape index: {}]  }
   0x1   :  { %7 = vsyncpa [#allocation4], 0  ;;  %s91_s6 = smov [#allocation2]   ;;  %s43_s10 = scalar_lea.hbm %s127_s0, 128 }
   0x2   :  { %s14_s7 = sshll.u32 %s91_s6, 4  ;;  %p44_p0 = scmp.ne.s32.totalorder %s127_s0, %s43_s10  ;;  %s15_s7 = int_to_ptr.vmem [resolvable:$true] %s14_s7 }
   0x3   :  { %p47_p1 = scmp.lt.u32.totalorder %s43_s10, %s127_s0 }
   0x5   :  { %p49_p2 = pnand %p47_p1, %p44_p0 }
   0x7   :  { %52 = shalt.err (!%p49_p2)
}
   0x8   :  { %s53_s15 = scalar_lea.vmem %s15_s7, 128  ;;  %p58_p4 = scmp.lt.s32.totalorder %s15_s7, %s15_s7 }
   0x9   :  { %p54_p3 = scmp.ne.s32.totalorder %s15_s7, %s53_s15  ;;  %p59_p5 = scmp.lt.s32.totalorder %s53_s15, %s53_s15 }
   0xb   :  { %p60_p6 = por %p59_p5, %p58_p4 }
   0xd   :  { %p61_p7 = pnand %p60_p6, %p54_p3 }
   0xf   :  { %64 = shalt.err (!%p61_p7)
}
  0x10   :  { %17 = dma.hbm_to_vmem [thread:$0]  %s127_s0, 128, %s15_s7, [#allocation3]  }
  0x11   :  { %87 = dma.done.wait [#allocation3], 128  }
  0x12   :  { %88 = vsyncadd [#allocation3], 4294967168  ;;  %v21_v0 = vld [vmem:[#allocation2] sm:$0xff]  ;;  %s92_s18 = smov [#allocation5]  }
  0x13   :  { %41 = verf.f32 %v21_v0  ;;  %s30_s19 = sshll.u32 %s92_s18, 4  ;;  %s31_s19 = int_to_ptr.vmem [resolvable:$true] %s30_s19 }
  0x14   :  { %s65_s20 = scalar_lea.vmem %s31_s19, 128  ;;  %p70_p9 = scmp.lt.s32.totalorder %s31_s19, %s31_s19 }
  0x15   :  { %p66_p8 = scmp.ne.s32.totalorder %s31_s19, %s65_s20  ;;  %p71_p10 = scmp.lt.s32.totalorder %s65_s20, %s65_s20 }
  0x17   :  { %p72_p11 = por %p71_p10, %p70_p9 }
  0x19   :  { %p73_p12 = pnand %p72_p11, %p66_p8 }
  0x1d   :  { %v42_v1 = vpop.eup %41 }
  0x1e   :  { %23 = vst [vmem:[#allocation5] sm:$0xff] %v42_v1 }
  0x1f   :  { %76 = shalt.err (!%p73_p12)
}
  0x20   :  { %s77_s0 = scalar_lea.hbm %s128_s1, 128 }
  0x21   :  { %p78_p13 = scmp.ne.s32.totalorder %s128_s1, %s77_s0  ;;  %p81_p0 = scmp.lt.u32.totalorder %s77_s0, %s128_s1 }
  0x23   :  { %p83_p1 = pnand %p81_p0, %p78_p13 }
  0x25   :  { %86 = shalt.err (!%p83_p1)
}
  0x26   :  { %33 = dma.vmem_to_hbm [thread:$0]  %s31_s19, 128, %s128_s1, [#allocation4]  }
  0x27   :  { %89 = dma.done.wait [#allocation4], 128  }
  0x28   :  { %90 = vsyncadd [#allocation4], 4294967168 }
  0x29   :  { %37 = vsyncpa [#allocation3], 1 }
  0x2a   :  { %38 = vsyncpa [#allocation4], 1 }

// kernel: tpu_custom_call.1
= control target key start
LH: loop header
LB: loop body
LE: loop exit
PB: predicated region body
PF: predicated region fallthrough
CT: control target
= control target key end

     0   :  { %16 = vsyncpa [#allocation3], 0  ;;  %s4233_s0 = inlined_call_operand.vmem [shape: s32[2,128,1], index: 0, kind: input, shape index: {}]   ;;  %s4234_s1 = inlined_call_operand.vmem [shape: f32[2,128,25], index: 1, kind: input, shape index: {}]   ;;  %s4235_s2 = inlined_call_operand.vmem [shape: f32[25,400], index: 2, kind: input, shape index: {}]   ;;  %s4236_s3 = inlined_call_operand.vmem [shape: f32[1,400], index: 3, kind: input, shape index: {}]   ;;  %s4237_s4 = inlined_call_operand.vmem [shape: bf16[66,128], index: 4, kind: input, shape index: {}]   ;;  %s4238_s5 = inlined_call_operand.vmem [shape: f32[1,128], index: 5, kind: input, shape index: {}]   ;;  %s4239_s6 = inlined_call_operand.vmem [shape: bf16[400,128], index: 6, kind: input, shape index: {}]   ;;  %s4240_s7 = inlined_call_operand.vmem [shape: f32[1,128], index: 7, kind: input, shape index: {}]   ;;  %s4241_s8 = inlined_call_operand.vmem [shape: f32[1,128], index: 8, kind: input, shape index: {}]   ;;  %s4242_s9 = inlined_call_operand.vmem [shape: bf16[128,128], index: 9, kind: input, shape index: {}]   ;;  %s4243_s10 = inlined_call_operand.vmem [shape: f32[1,128], index: 10, kind: input, shape index: {}]   ;;  %s4244_s11 = inlined_call_operand.hbm [shape: f32[2,128,128], index: 11, kind: output, shape index: {}]  }
   0x1   :  { %18 = vsyncpa [#allocation3 + $0x1], 0  ;;  %s3202_s17 = smov 0   ;;  %s3204_s18 = smov 0  }
   0x2   :  { %s3206_s19 = smov 0   ;;  %s3208_s20 = smov 0  }
   0x3   :  { %s3210_s21 = smov 0   ;;  %s3212_s22 = smov 0  }
   0x4 LB: > { %4247 = sst [smem:[#allocation5_spill]] %s3130_s21  ;;  %s2496_s23 = sadd.s32 4294967295, %s3134_s22   ;;  %s3134_s22 = sphi %s3212_s22, %s24_s22   ;;  %s3130_s21 = sphi %s3210_s21, %s4254_s21   ;;  %s3126_s20 = sphi %s3208_s20, %s4253_s20   ;;  %s3122_s19 = sphi %s3206_s19, %s4257_s19   ;;  %s3118_s18 = sphi %s3204_s18, %s4256_s18   ;;  %s3114_s17 = sphi %s3202_s17, %s4255_s17  }
   0x5   : > { %s2497_s24 = sadd.s32 4294967294, %s3134_s22   ;;  %s36_s25 = sadd.s32 1, %s3130_s21 }
   0x6   : > { %s290_s26 = sadd.s32 1, %s3122_s19  ;;  %p38_p0 = scmp.ge.s32.totalorder %s36_s25, 2 }
   0x7   : > { %p300_p1 = scmp.ne.s32.totalorder %s3122_s19, %s3118_s18  ;;  %p301_p2 = scmp.eq.s32.totalorder %s2496_s23, 1 }
   0x8   : > { %p306_p3 = scmp.ne.s32.totalorder %s3118_s18, %s3114_s17  ;;  %s4259_s25 = smov (%p38_p0, %s36_s25), 0 }
   0x9   : > { %4248 = sst [smem:[#allocation6_spill]] %s4259_s25  ;;  %p3242_p4 = por %p301_p2, %p300_p1 }
   0xa   : > { %p307_p5 = scmp.eq.s32.totalorder %s2497_s24, 1  ;;  %s285_s28 = ssub.s32 %s3130_s21, %s4259_s25 }
   0xb   : > { %p2500_p6 = scmp.ge.s32.totalorder %s3134_s22, 1  ;;  %p288_p7 = scmp.eq.s32.totalorder %s285_s28, 0 }
   0xc   : > { %p3249_p8 = por %p307_p5, %p306_p3  ;;  %p378_p9 = scmp.lt.s32.totalorder %s3134_s22, 3 }
   0xd   : > { %s3255_s30 = scalar_select %p288_p7, %s3122_s19, %s290_s26  }
   0xe   : > { %p379_p10 = pnand %p2500_p6, %p378_p9 }
   0xf   : > { %v592_v0 = vld [vmem:[%s4235_s2 + $0x8] sm:$0xff] (!%p379_p10)  ;;  %v591_v2 = vld [vmem:[%s4235_s2] sm:$0xff] (!%p379_p10)  ;;  %vm656_vm0 = vcmask (!%p379_p10), 1040384   ;;  %v594_v5 = vld [vmem:[%s4235_s2 + $0x18] sm:$0xff] (!%p379_p10)  ;;  %v3136_v7 = vmov (!%p379_p10), 0.0   ;;  %p432_p11 = scmp.lt.s32.totalorder (!%p379_p10), %s3126_s20, 1 }
  0x10   : > { %382 = sbr.rel (%p379_p10) target bundleno = 1146 (0x47a), region = 64  ;;  %v596_v1 = vld [vmem:[%s4235_s2 + $0x28] sm:$0xff] (!%p379_p10)  ;;  %v595_v4 = vld [vmem:[%s4235_s2 + $0x20] sm:$0xff] (!%p379_p10)  ;;  %v598_v6 = vld [vmem:[%s4235_s2 + $0x38] sm:$0xff] (!%p379_p10)  ;;  %733 = vmatprep.mubr.f32.mxu0 (!%p379_p10), %v3136_v7  ;;  %894 = vmatprep.mubr.f32.mxu1 (!%p379_p10), %v3136_v7  ;;  %vm3137_vm1 = vmmov (!%p379_p10), 1   ;;  %v3138_v13 = vmov (!%p379_p10), 0  }
  0x11   : > { %v2775_v3 = vpack.c.bf16 (!%p379_p10), %v596_v1, %v592_v0  ;;  %v2777_v8 = vpack.c.bf16 (!%p379_p10), %v595_v4, %v591_v2  ;;  %v2785_v9 = vpack.c.bf16 (!%p379_p10), %v598_v6, %v594_v5  ;;  %v600_v10 = vld [vmem:[%s4235_s2 + $0x48] sm:$0xff] (!%p379_p10)  ;;  %vm3285_vm2 = vmpackc.low (!%p379_p10), %vm656_vm0, %vm3137_vm1  ;;  %2857 = vset.pattern.permute.xlu1 (!%p379_p10), %v3138_v13  ;;  %2856 = vset.pattern.permute.xlu0 (!%p379_p10), %v3138_v13  ;;  %v593_v15 = vld [vmem:[%s4235_s2 + $0x10] sm:$0xff] (!%p379_p10)  ;;  %vm607_vm3 = vcmask (!%p379_p10), 203776   ;;  %s2623_s15 = sshll.u32 (!%p379_p10), %s3126_s20, 11 }
  0x12   : > { %v604_v11 = vld [vmem:[%s4235_s2 + $0x68] sm:$0x1] (!%p379_p10)  ;;  %v597_v16 = vld [vmem:[%s4235_s2 + $0x30] sm:$0xff] (!%p379_p10)  ;;  %v599_v17 = vld [vmem:[%s4235_s2 + $0x40] sm:$0xff] (!%p379_p10)  ;;  %vm1574_vm4 = vcmask (!%p379_p10), 130048   ;;  %vm1820_vm7 = vcmask (!%p379_p10), 539648   ;;  %s4178_s23 = scalar_lea.hbm (!%p379_p10), %s4244_s11, %s2623_s15 }
  0x13   : > { %2776 = vmatprep.subr.bf16.mxu0 (!%p379_p10), %v2775_v3  ;;  %v2779_v14 = vpack.c.bf16 (!%p379_p10), %v604_v11, %v600_v10  ;;  %2786 = vmatprep.subr.bf16.mxu1 (!%p379_p10), %v2785_v9  ;;  %v2787_v18 = vpack.c.bf16 (!%p379_p10), %v597_v16, %v593_v15  ;;  %v603_v19 = vld [vmem:[%s4235_s2 + $0x60] sm:$0x1] (!%p379_p10)  ;;  %v602_v20 = vld [vmem:[%s4235_s2 + $0x58] sm:$0xff] (!%p379_p10)  ;;  %v601_v24 = vld [vmem:[%s4235_s2 + $0x50] sm:$0xff] (!%p379_p10) }
  0x14   : > { %2778 = vmatpush1.bf16.msra.mxu0 (!%p379_p10), %v2777_v8  ;;  %v606_v21 = vld [vmem:[%s4235_s2 + $0x78] sm:$0x1] (!%p379_p10)  ;;  %v2782_v22 = vpack.c.bf16 (!%p379_p10), %v603_v19, %v599_v17  ;;  %v605_v25 = vld [vmem:[%s4235_s2 + $0x70] sm:$0x1] (!%p379_p10)  ;;  %v2858_v27 = vld [vmem:[%s4239_s6 + $0x40] sm:$0xff] (!%p379_p10)  }
  0x15   : > { %2781 = vmatprep.subr.msk.bf16.mxu0 (!%p379_p10), %vm3285_vm2, %v2779_v14  ;;  %v2789_v23 = vpack.c.bf16 (!%p379_p10), %v606_v21, %v602_v20  ;;  %2788 = vmatpush1.bf16.msra.mxu1 (!%p379_p10), %v2787_v18  ;;  %v2792_v26 = vpack.c.bf16 (!%p379_p10), %v605_v25, %v601_v24  ;;  %v2859_v38 = vld [vmem:[%s4239_s6] sm:$0xff] (!%p379_p10)   ;;  %v2860_v39 = vld [vmem:[%s4239_s6 + $0x48] sm:$0xff] (!%p379_p10)   ;;  %v2862_v44 = vld [vmem:[%s4239_s6 + $0x50] sm:$0xff] (!%p379_p10)  }
  0x16   : > { %v2861_v40 = vld [vmem:[%s4239_s6 + $0x8] sm:$0xff] (!%p379_p10)   ;;  %v2863_v46 = vld [vmem:[%s4239_s6 + $0x10] sm:$0xff] (!%p379_p10)   ;;  %v2864_v49 = vld [vmem:[%s4239_s6 + $0x58] sm:$0xff] (!%p379_p10)  }
  0x17   : > { %s433_s14 = scalar_select %p432_p11, %s3126_s20, 1  ;;  %2791 = vmatprep.subr.msk.bf16.mxu1 %vm3285_vm2, %v2789_v23  ;;  %v2865_v50 = vld [vmem:[%s4239_s6 + $0x18] sm:$0xff]   ;;  %v2866_v53 = vld [vmem:[%s4239_s6 + $0x60] sm:$0xff]   ;;  %v2869_v6 = vld [vmem:[%s4239_s6 + $0x88] sm:$0xff]   ;;  %v485_v23 = vlaneseq }
  0x18   : > { %2784 = vmatpush1.bf16.msk.msra.mxu0 %vm3285_vm2, %v2782_v22  ;;  %v2867_v55 = vld [vmem:[%s4239_s6 + $0x20] sm:$0xff]   ;;  %v2872_v8 = vld [vmem:[%s4239_s6 + $0x90] sm:$0xff]   ;;  %v2873_v9 = vld [vmem:[%s4239_s6 + $0x98] sm:$0xff]  }
  0x19   : > { %s2621_s28 = sshll.u32 %s433_s14, 7  ;;  %2624 = vmatprep.subr.bf16.mxu0 %v2858_v27  ;;  %2794 = vmatpush1.bf16.msk.msra.mxu1 %vm3285_vm2, %v2792_v26  ;;  %v2868_v58 = vld [vmem:[%s4239_s6 + $0x80] sm:$0xff]   ;;  %v2870_v10 = vld [vmem:[%s4239_s6 + $0x68] sm:$0xff]   ;;  %v2874_v15 = vld [vmem:[%s4239_s6 + $0x70] sm:$0xff]   ;;  %v994_v24 = vshrl.u32 %v485_v23, 7  ;;  %s428_s14 = sand.u32 1, %s3118_s18  }
  0x1a   : > { %s3323_s24 = scalar_lea.vmem %s4234_s1, %s2621_s28  ;;  %s3336_s13 = scalar_lea.vmem %s4233_s0, %s2621_s28  ;;  %1696 = vmatprep.subr.bf16.mxu1 %v3138_v13  ;;  %v2876_v11 = vld [vmem:[%s4239_s6 + $0xa0] sm:$0xff]   ;;  %v2871_v12 = vld [vmem:[%s4239_s6 + $0x28] sm:$0xff]   ;;  %v2875_v16 = vld [vmem:[%s4239_s6 + $0x30] sm:$0xff]  }
  0x1b   : > { %v469_v28 = vld [vmem:[%s3323_s24] sm:$0xff]  ;;  %v470_v29 = vld [vmem:[%s3323_s24 + $0x8] sm:$0xff]  ;;  %v455_v30 = vld [vmem:[%s3336_s13 + $0x10] sm:$0xff]  ;;  %v995_v25 = vsub.s32 0, %v994_v24  ;;  %v999_v26 = vsub.s32 1, %v994_v24  ;;  %v1003_v27 = vsub.s32 2, %v994_v24 }
  0x1c   : > { %2524 = vmatmul.mubr.msk.f32.vlgmr.msra.gmra.mrb[0].mxu0 %vm607_vm3, %v469_v28  ;;  %v453_v31 = vld [vmem:[%s3336_s13] sm:$0xff]  ;;  %2542 = vmatmul.mubr.msk.f32.vlgmr.msra.gmra.mrb[0].mxu1 %vm607_vm3, %v469_v28  ;;  %v456_v32 = vld [vmem:[%s3336_s13 + $0x18] sm:$0xff]  ;;  %v454_v33 = vld [vmem:[%s3336_s13 + $0x8] sm:$0xff]  ;;  %v1007_v28 = vsub.s32 3, %v994_v24  ;;  %s2501_s12 = sshll.u32 %s428_s14, 7  ;;  %s4187_s20 = scalar_lea.sflag [#allocation3], %s428_s14 }
  0x1d   : > { %739 = vmatprep.mubr.f32.mxu0 %v3136_v7  ;;  %494 = vperm.xlu1 %2857, %v455_v30   ;;  %v471_v34 = vld [vmem:[%s3323_s24 + $0x10] sm:$0xff]  ;;  %v458_v35 = vld [vmem:[%s3336_s13 + $0x28] sm:$0xff]  ;;  %v457_v36 = vld [vmem:[%s3336_s13 + $0x20] sm:$0xff] }
  0x1e   : > { %900 = vmatprep.mubr.f32.mxu1 %v3136_v7  ;;  %488 = vperm.xlu0 %2856, %v453_v31   ;;  %v472_v37 = vld [vmem:[%s3323_s24 + $0x18] sm:$0xff]  ;;  %v473_v42 = vld [vmem:[%s3323_s24 + $0x20] sm:$0xff]  ;;  %v459_v43 = vld [vmem:[%s3336_s13 + $0x30] sm:$0xff] }
  0x1f   : > { %2625 = vmatpush3.bf16.msra.mxu0 %v2859_v38  ;;  %v460_v41 = vld [vmem:[%s3336_s13 + $0x38] sm:$0xff]  ;;  %v462_v45 = vld [vmem:[%s3336_s13 + $0x48] sm:$0xff]  ;;  %v461_v47 = vld [vmem:[%s3336_s13 + $0x40] sm:$0xff]  ;;  %1697 = vmatpush1.bf16.msra.mxu1 %v2868_v58 }
  0x20   : > { %2525 = vmatmul.mubr.msk.f32.gmra.mrb[2].mxu0 %vm607_vm3, %v470_v29  ;;  %2543 = vmatmul.mubr.msk.f32.gmra.mrb[2].mxu1 %vm607_vm3, %v470_v29  ;;  %v474_v48 = vld [vmem:[%s3323_s24 + $0x28] sm:$0xff]  ;;  %v464_v51 = vld [vmem:[%s3336_s13 + $0x58] sm:$0xff]  ;;  %v463_v52 = vld [vmem:[%s3336_s13 + $0x50] sm:$0xff] }
  0x21   : > { %745 = vmatprep.mubr.f32.mxu0 %v3136_v7  ;;  %497 = vperm.xlu1 %2857, %v456_v32   ;;  %v475_v54 = vld [vmem:[%s3323_s24 + $0x30] sm:$0xff]  ;;  %v466_v56 = vld [vmem:[%s3336_s13 + $0x68] sm:$0xff]  ;;  %v465_v57 = vld [vmem:[%s3336_s13 + $0x60] sm:$0xff] }
  0x22   : > { %906 = vmatprep.mubr.f32.mxu1 %v3136_v7  ;;  %491 = vperm.xlu0 %2856, %v454_v33   ;;  %v476_v59 = vld [vmem:[%s3323_s24 + $0x38] sm:$0xff]  ;;  %v467_v61 = vld [vmem:[%s3336_s13 + $0x70] sm:$0xff]  ;;  %v477_v62 = vld [vmem:[%s3323_s24 + $0x40] sm:$0xff] }
  0x23   : > { %2626 = vmatprep.subr.bf16.mxu0 %v2860_v39  ;;  %v468_v60 = vld [vmem:[%s3336_s13 + $0x78] sm:$0xff]  ;;  %1698 = vmatprep.subr.bf16.mxu1 %v3138_v13  ;;  %v478_v63 = vld [vmem:[%s3323_s24 + $0x48] sm:$0xff]  ;;  %v479_v0 = vld [vmem:[%s3323_s24 + $0x50] sm:$0xff]  ;;  %s4158_s13 = scalar_lea.vmem [#allocation2], %s2501_s12  ;;  %s3139_s12 = smov [#allocation2]  }
  0x24   : > { %2526 = vmatmul.mubr.msk.f32.gmra.mrb[4].mxu0 %vm607_vm3, %v471_v34  ;;  %2544 = vmatmul.mubr.msk.f32.gmra.mrb[4].mxu1 %vm607_vm3, %v471_v34  ;;  %v480_v1 = vld [vmem:[%s3323_s24 + $0x58] sm:$0xff]  ;;  %v481_v2 = vld [vmem:[%s3323_s24 + $0x60] sm:$0xff]  ;;  %v482_v3 = vld [vmem:[%s3323_s24 + $0x68] sm:$0xff]  ;;  %s2399_s25 = sshll.u32 %s4158_s13, 4  ;;  %s3060_s21 = sshll.u32 %s3139_s12, 4  ;;  %s4180_s25 = int_to_ptr.vmem [resolvable:$true] %s2399_s25  ;;  %s3061_s21 = int_to_ptr.vmem [resolvable:$false] %s3060_s21 }
  0x25   : > { %751 = vmatprep.mubr.f32.mxu0 %v3136_v7  ;;  %503 = vperm.xlu1 %2857, %v458_v35   ;;  %v483_v4 = vld [vmem:[%s3323_s24 + $0x70] sm:$0xff]  ;;  %v484_v5 = vld [vmem:[%s3323_s24 + $0x78] sm:$0xff]  ;;  %v2877_v14 = vld [vmem:[%s4239_s6 + $0xa8] sm:$0xff]   ;;  %s3056_s26 = scalar_lea.vmem %s4180_s25, 2048  ;;  %s3062_s28 = scalar_lea.vmem %s3061_s21, 4096 }
  0x26   : > { %912 = vmatprep.mubr.f32.mxu1 %v3136_v7  ;;  %500 = vperm.xlu0 %2856, %v457_v36   ;;  %v2880_v17 = vld [vmem:[%s4239_s6 + $0xb0] sm:$0xff]   ;;  %v2878_v18 = vld [vmem:[%s4239_s6 + $0x78] sm:$0xff]   ;;  %v2883_v21 = vld [vmem:[%s4239_s6 + $0xc0] sm:$0xff]   ;;  %p3057_p12 = scmp.ne.s32.totalorder %s4180_s25, %s3056_s26  ;;  %p3063_p1 = scmp.lt.s32.totalorder %s4180_s25, %s3061_s21 }
  0x27   : > { %2627 = vmatpush3.bf16.msra.mxu0 %v2861_v40  ;;  %1699 = vmatpush1.bf16.msra.mxu1 %v2869_v6  ;;  %v2879_v19 = vld [vmem:[%s4239_s6 + $0x38] sm:$0xff]   ;;  %v3517_v22 = vld [vmem:[%s4237_s4] sm:$0xff]   ;;  %p3064_p2 = scmp.lt.s32.totalorder %s3062_s28, %s3056_s26 }
  0x28   : > { %2527 = vmatmul.mubr.msk.f32.gmra.mrb[6].mxu0 %vm607_vm3, %v472_v37  ;;  %2545 = vmatmul.mubr.msk.f32.gmra.mrb[6].mxu1 %vm607_vm3, %v472_v37  ;;  %v2881_v20 = vld [vmem:[%s4239_s6 + $0xb8] sm:$0xff]   ;;  %v3537_v38 = vld [vmem:[%s4237_s4 + $0x20] ss:$0 sps:$4 sm:$0x11]   ;;  %p3058_p13 = pnand %p3057_p12, %p3242_p4 }
  0x29   : > { %757 = vmatprep.mubr.f32.mxu0 %v3136_v7  ;;  %509 = vperm.xlu1 %2857, %v460_v41   ;;  %p3065_p3 = por %p3064_p2, %p3063_p1 }
  0x2a   : > { %918 = vmatprep.mubr.f32.mxu1 %v3136_v7  ;;  %506 = vperm.xlu0 %2856, %v459_v43   ;;  %p3059_p0 = pneg %p3058_p13 }
  0x2b   : > { %2628 = vmatprep.subr.bf16.mxu0 %v2862_v44  ;;  %1700 = vmatprep.subr.bf16.mxu1 %v3138_v13 }
  0x2c   : > { %2528 = vmatmul.mubr.msk.f32.gmra.mrb[8].mxu0 %vm607_vm3, %v473_v42  ;;  %2546 = vmatmul.mubr.msk.f32.gmra.mrb[8].mxu1 %vm607_vm3, %v473_v42  ;;  %p3066_p5 = pnand %p3065_p3, %p3059_p0 }
  0x2d   : > { %763 = vmatprep.mubr.f32.mxu0 %v3136_v7  ;;  %2629 = vmatpush3.bf16.msra.mxu0 %v2863_v46 }
  0x2e   : > { %515 = vperm.xlu1 %2857, %v462_v45   ;;  %924 = vmatprep.mubr.f32.mxu1 %v3136_v7 }
  0x2f   : > { %512 = vperm.xlu0 %2856, %v461_v47   ;;  %2630 = vmatprep.subr.bf16.mxu0 %v2864_v49 }
  0x30   : > { %2529 = vmatmul.mubr.msk.f32.gmra.mrb[10].mxu0 %vm607_vm3, %v474_v48  ;;  %2547 = vmatmul.mubr.msk.f32.gmra.mrb[10].mxu1 %vm607_vm3, %v474_v48 }
  0x31   : > { %769 = vmatprep.mubr.f32.mxu0 %v3136_v7  ;;  %2631 = vmatpush3.bf16.msra.mxu0 %v2865_v50 }
  0x32   : > { %521 = vperm.xlu1 %2857, %v464_v51   ;;  %930 = vmatprep.mubr.f32.mxu1 %v3136_v7 }
  0x33   : > { %518 = vperm.xlu0 %2856, %v463_v52   ;;  %2632 = vmatprep.subr.bf16.mxu0 %v2866_v53  ;;  %v3545_v53 = vsel %vm656_vm0, %v3537_v38, 0 }
  0x34   : > { %2530 = vmatmul.mubr.msk.f32.gmra.mrb[12].mxu0 %vm607_vm3, %v475_v54  ;;  %2548 = vmatmul.mubr.msk.f32.gmra.mrb[12].mxu1 %vm607_vm3, %v475_v54 }
  0x35   : > { %775 = vmatprep.mubr.f32.mxu0 %v3136_v7  ;;  %2633 = vmatpush3.bf16.msra.mxu0 %v2867_v55 }
  0x36   : > { %527 = vperm.xlu1 %2857, %v466_v56   ;;  %936 = vmatprep.mubr.f32.mxu1 %v3136_v7 }
  0x37   : > { %524 = vperm.xlu0 %2856, %v465_v57   ;;  %1701 = vmatpush1.bf16.msra.mxu1 %v2872_v8 }
  0x38   : > { %2531 = vmatmul.mubr.msk.f32.gmra.mrb[14].mxu0 %vm607_vm3, %v476_v59  ;;  %2549 = vmatmul.mubr.msk.f32.gmra.mrb[14].mxu1 %vm607_vm3, %v476_v59 }
  0x39   : > { %781 = vmatprep.mubr.f32.mxu0 %v3136_v7  ;;  %942 = vmatprep.mubr.f32.mxu1 %v3136_v7 }
  0x3a   : > { %533 = vperm.xlu1 %2857, %v468_v60   ;;  %1702 = vmatprep.subr.bf16.mxu1 %v3138_v13 }
  0x3b   : > { %530 = vperm.xlu0 %2856, %v467_v61   ;;  %1703 = vmatpush1.bf16.msra.mxu1 %v2873_v9 }
  0x3c   : > { %2532 = vmatmul.mubr.msk.f32.gmra.mrb[16].mxu0 %vm607_vm3, %v477_v62  ;;  %2550 = vmatmul.mubr.msk.f32.gmra.mrb[16].mxu1 %vm607_vm3, %v477_v62 }
  0x3d   : > { %787 = vmatprep.mubr.f32.mxu0 %v3136_v7  ;;  %948 = vmatprep.mubr.f32.mxu1 %v3136_v7 }
  0x3e   : > { %1704 = vmatprep.subr.bf16.mxu1 %v3138_v13  ;;  %2634 = vmatprep.subr.bf16.mxu0 %v2870_v10 }
  0x3f   : > { %1705 = vmatpush1.bf16.msra.mxu1 %v2876_v11  ;;  %2635 = vmatpush3.bf16.msra.mxu0 %v2871_v12 }
  0x40   : > { %2533 = vmatmul.mubr.msk.f32.gmra.mrb[18].mxu0 %vm607_vm3, %v478_v63  ;;  %2551 = vmatmul.mubr.msk.f32.gmra.mrb[18].mxu1 %vm607_vm3, %v478_v63 }
  0x41   : > { %793 = vmatprep.mubr.f32.mxu0 %v3136_v7  ;;  %954 = vmatprep.mubr.f32.mxu1 %v3136_v7 }
  0x42   : > { %1706 = vmatprep.subr.bf16.mxu1 %v3138_v13  ;;  %2636 = vmatprep.subr.bf16.mxu0 %v2874_v15 }
  0x43   : > { %1707 = vmatpush1.bf16.msra.mxu1 %v2877_v14  ;;  %2637 = vmatpush3.bf16.msra.mxu0 %v2875_v16 }
  0x44   : > { %2534 = vmatmul.mubr.msk.f32.gmra.mrb[20].mxu0 %vm607_vm3, %v479_v0  ;;  %2552 = vmatmul.mubr.msk.f32.gmra.mrb[20].mxu1 %vm607_vm3, %v479_v0 }
  0x45   : > { %799 = vmatprep.mubr.f32.mxu0 %v3136_v7  ;;  %960 = vmatprep.mubr.f32.mxu1 %v3136_v7 }
  0x46   : > { %1708 = vmatprep.subr.bf16.mxu1 %v3138_v13  ;;  %2638 = vmatprep.subr.bf16.mxu0 %v2878_v18 }
  0x47   : > { %1709 = vmatpush1.bf16.msra.mxu1 %v2880_v17  ;;  %2639 = vmatpush3.bf16.msra.mxu0 %v2879_v19 }
  0x48   : > { %2535 = vmatmul.mubr.msk.f32.gmra.mrb[22].mxu0 %vm607_vm3, %v480_v1  ;;  %2553 = vmatmul.mubr.msk.f32.gmra.mrb[22].mxu1 %vm607_vm3, %v480_v1 }
  0x49   : > { %805 = vmatprep.mubr.f32.mxu0 %v3136_v7  ;;  %966 = vmatprep.mubr.f32.mxu1 %v3136_v7 }
  0x4a   : > { %1710 = vmatprep.subr.bf16.mxu1 %v3138_v13  ;;  %2717 = vmatprep.subr.bf16.mxu0 %v3517_v22 }
  0x4b   : > { %1711 = vmatpush1.bf16.msra.mxu1 %v2881_v20 }
  0x4c   : > { %2536 = vmatmul.mubr.msk.f32.gmra.mrb[24].mxu0 %vm607_vm3, %v481_v2  ;;  %2554 = vmatmul.mubr.msk.f32.gmra.mrb[24].mxu1 %vm607_vm3, %v481_v2 }
  0x4d   : > { %811 = vmatprep.mubr.f32.mxu0 %v3136_v7  ;;  %972 = vmatprep.mubr.f32.mxu1 %v3136_v7 }
  0x4e   : > { %1712 = vmatprep.subr.bf16.mxu1 %v3138_v13  ;;  %v991_v13 = vld [vmem:[%s4236_s3] sm:$0xf] }
  0x4f   : > { %1713 = vmatpush1.bf16.msra.mxu1 %v2883_v21  ;;  %v3524_v29 = vrot.slane %v991_v13, %v995_v25  ;;  %v3526_v30 = vrot.slane %v991_v13, %v999_v26  ;;  %v3528_v31 = vrot.slane %v991_v13, %v1003_v27  ;;  %v3530_v33 = vrot.slane %v991_v13, %v1007_v28 }
  0x50   : > { %2537 = vmatmul.mubr.msk.f32.gmra.mrb[26].mxu0 %vm607_vm3, %v482_v3  ;;  %2555 = vmatmul.mubr.msk.f32.gmra.mrb[26].mxu1 %vm607_vm3, %v482_v3 }
  0x51   : > { %817 = vmatprep.mubr.f32.mxu0 %v3136_v7  ;;  %978 = vmatprep.mubr.f32.mxu1 %v3136_v7 }
  0x54   : > { %2538 = vmatmul.mubr.msk.f32.gmra.mrb[28].mxu0 %vm607_vm3, %v483_v4  ;;  %2556 = vmatmul.mubr.msk.f32.gmra.mrb[28].mxu1 %vm607_vm3, %v483_v4 }
  0x55   : > { %823 = vmatprep.mubr.f32.mxu0 %v3136_v7  ;;  %984 = vmatprep.mubr.f32.mxu1 %v3136_v7 }
  0x58   : > { %2539 = vmatmul.mubr.msk.f32.gmra.mrb[30].mxu0 %vm607_vm3, %v484_v5  ;;  %2557 = vmatmul.mubr.msk.f32.gmra.mrb[30].mxu1 %vm607_vm3, %v484_v5 }
  0xef   : > { %v735_v32 = vpop.f32.mrb[0].mxu0  ;;  %v896_v37 = vpop.f32.mrb[0].mxu1 }
  0xf0   : > { %v1013_v34 = vsub.f32 %v735_v32, %v3524_v29  ;;  %v737_v35 = vpop.f32.mrb[1].mxu0  ;;  %v1015_v40 = vsub.f32 %v896_v37, %v3528_v31  ;;  %v898_v41 = vpop.f32.mrb[1].mxu1 }
  0xf1   : > { %v1014_v36 = vsub.f32 %v737_v35, %v3526_v30  ;;  %v1016_v44 = vsub.f32 %v898_v41, %v3530_v33 }
  0xf2   : > { %v1077_v39 = vmul.f32 %v1013_v34, %v1013_v34  ;;  %v1079_v48 = vmul.f32 %v1015_v40, %v1015_v40 }
  0xf3   : > { %v1078_v42 = vmul.f32 %v1014_v36, %v1014_v36  ;;  %v741_v43 = vpop.f32.mrb[2].mxu0  ;;  %v1080_v51 = vmul.f32 %v1016_v44, %v1016_v44  ;;  %v902_v52 = vpop.f32.mrb[2].mxu1 }
  0xf4   : > { %v1141_v45 = vsub.f32 0.0, %v1077_v39  ;;  %v1017_v46 = vsub.f32 %v741_v43, %v3524_v29  ;;  %v743_v47 = vpop.f32.mrb[3].mxu0  ;;  %v1143_v56 = vsub.f32 0.0, %v1079_v48  ;;  %v1019_v57 = vsub.f32 %v902_v52, %v3528_v31  ;;  %v904_v58 = vpop.f32.mrb[3].mxu1 }
  0xf5   : > { %v1142_v49 = vsub.f32 0.0, %v1078_v42  ;;  %v1018_v50 = vsub.f32 %v743_v47, %v3526_v30  ;;  %v1144_v61 = vsub.f32 0.0, %v1080_v51  ;;  %v1020_v63 = vsub.f32 %v904_v58, %v3530_v33 }
  0xf6   : > { %v1205_v54 = vmul.f32 1.442695, %v1141_v45  ;;  %v1081_v55 = vmul.f32 %v1017_v46, %v1017_v46  ;;  %v1209_v1 = vmul.f32 1.442695, %v1143_v56  ;;  %v1083_v2 = vmul.f32 %v1019_v57, %v1019_v57 }
  0xf7   : > { %v1207_v59 = vmul.f32 1.442695, %v1142_v49  ;;  %v1082_v60 = vmul.f32 %v1018_v50, %v1018_v50  ;;  %v747_v62 = vpop.f32.mrb[4].mxu0  ;;  %v1211_v5 = vmul.f32 1.442695, %v1144_v61  ;;  %v908_v8 = vpop.f32.mrb[4].mxu1  ;;  %v1084_v11 = vmul.f32 %v1020_v63, %v1020_v63 }
  0xf8   : > { %2896 = vpow2.f32 %v1205_v54  ;;  %v1145_v0 = vsub.f32 0.0, %v1081_v55  ;;  %v749_v3 = vpop.f32.mrb[5].mxu0  ;;  %v1021_v6 = vsub.f32 %v747_v62, %v3524_v29  ;;  %v1147_v10 = vsub.f32 0.0, %v1083_v2  ;;  %v910_v12 = vpop.f32.mrb[5].mxu1 }
  0xf9   : > { %2898 = vpow2.f32 %v1207_v59  ;;  %v1146_v4 = vsub.f32 0.0, %v1082_v60  ;;  %v1022_v16 = vsub.f32 %v749_v3, %v3526_v30  ;;  %v1148_v19 = vsub.f32 0.0, %v1084_v11 }
  0xfa   : > { %v1213_v9 = vmul.f32 1.442695, %v1145_v0  ;;  %2900 = vpow2.f32 %v1209_v1  ;;  %v1085_v15 = vmul.f32 %v1021_v6, %v1021_v6  ;;  %v1217_v18 = vmul.f32 1.442695, %v1147_v10 }
  0xfb   : > { %v1215_v14 = vmul.f32 1.442695, %v1146_v4  ;;  %2902 = vpow2.f32 %v1211_v5  ;;  %v753_v17 = vpop.f32.mrb[6].mxu0  ;;  %v1086_v25 = vmul.f32 %v1022_v16, %v1022_v16  ;;  %v914_v26 = vpop.f32.mrb[6].mxu1  ;;  %v1219_v27 = vmul.f32 1.442695, %v1148_v19 }
  0xfc   : > { %2904 = vpow2.f32 %v1213_v9  ;;  %v1025_v20 = vsub.f32 %v753_v17, %v3524_v29  ;;  %v755_v21 = vpop.f32.mrb[7].mxu0  ;;  %v1149_v24 = vsub.f32 0.0, %v1085_v15  ;;  %v1023_v32 = vsub.f32 %v908_v8, %v3528_v31  ;;  %v916_v34 = vpop.f32.mrb[7].mxu1 }
  0xfd   : > { %2906 = vpow2.f32 %v1215_v14  ;;  %v1026_v13 = vsub.f32 %v755_v21, %v3526_v30  ;;  %v1150_v36 = vsub.f32 0.0, %v1086_v25  ;;  %v1024_v39 = vsub.f32 %v910_v12, %v3530_v33 }
  0xfe   : > { %2908 = vpow2.f32 %v1217_v18  ;;  %v1089_v28 = vmul.f32 %v1025_v20, %v1025_v20  ;;  %v1221_v35 = vmul.f32 1.442695, %v1149_v24  ;;  %v1087_v42 = vmul.f32 %v1023_v32, %v1023_v32 }
  0xff   : > { %v1090_v37 = vmul.f32 %v1026_v13, %v1026_v13  ;;  %v759_v40 = vpop.f32.mrb[8].mxu0  ;;  %2910 = vpow2.f32 %v1219_v27  ;;  %v1027_v43 = vsub.f32 %v914_v26, %v3528_v31  ;;  %v1223_v45 = vmul.f32 1.442695, %v1150_v36  ;;  %v920_v48 = vpop.f32.mrb[8].mxu1 }
 0x100   : > { %v1153_v41 = vsub.f32 0.0, %v1089_v28  ;;  %v761_v44 = vpop.f32.mrb[9].mxu0  ;;  %2912 = vpow2.f32 %v1221_v35  ;;  %v1088_v47 = vmul.f32 %v1024_v39, %v1024_v39  ;;  %v1151_v51 = vsub.f32 0.0, %v1087_v42  ;;  %v922_v55 = vpop.f32.mrb[9].mxu1 }
 0x101   : > { %v1154_v46 = vsub.f32 0.0, %v1090_v37  ;;  %v1091_v52 = vmul.f32 %v1027_v43, %v1027_v43  ;;  %v1029_v54 = vsub.f32 %v759_v40, %v3524_v29  ;;  %2914 = vpow2.f32 %v1223_v45 }
 0x102   : > { %v3556_v49 = vpop.eup %2896  ;;  %v1229_v50 = vmul.f32 1.442695, %v1153_v41  ;;  %v1152_v58 = vsub.f32 0.0, %v1088_v47  ;;  %v1028_v59 = vsub.f32 %v916_v34, %v3530_v33  ;;  %v1225_v62 = vmul.f32 1.442695, %v1151_v51 }
 0x103   : > { %v3559_v56 = vpop.eup %2898  ;;  %v1231_v57 = vmul.f32 1.442695, %v1154_v46  ;;  %v765_v60 = vpop.f32.mrb[10].mxu0  ;;  %v1155_v63 = vsub.f32 0.0, %v1091_v52  ;;  %v1093_v0 = vmul.f32 %v1029_v54, %v1029_v54  ;;  %v1030_v5 = vsub.f32 %v761_v44, %v3526_v30 }
 0x104   : > { %v3562_v61 = vpop.eup %2900  ;;  %2916 = vpow2.f32 %v1229_v50  ;;  %v767_v1 = vpop.f32.mrb[11].mxu0  ;;  %v1227_v3 = vmul.f32 1.442695, %v1152_v58  ;;  %v1092_v4 = vmul.f32 %v1028_v59, %v1028_v59  ;;  %v1033_v11 = vsub.f32 %v765_v60, %v3524_v29 }
 0x105   : > { %v3564_v2 = vpop.eup %2902  ;;  %2918 = vpow2.f32 %v1231_v57  ;;  %v926_v6 = vpop.f32.mrb[10].mxu1  ;;  %v1233_v9 = vmul.f32 1.442695, %v1155_v63  ;;  %v1157_v10 = vsub.f32 0.0, %v1093_v0  ;;  %v1094_v16 = vmul.f32 %v1030_v5, %v1030_v5 }
 0x106   : > { %v3567_v8 = vpop.eup %2904  ;;  %2920 = vpow2.f32 %v1225_v62  ;;  %v928_v12 = vpop.f32.mrb[11].mxu1  ;;  %v1156_v15 = vsub.f32 0.0, %v1092_v4  ;;  %v1034_v17 = vsub.f32 %v767_v1, %v3526_v30  ;;  %v1097_v21 = vmul.f32 %v1033_v11, %v1033_v11 }
 0x107   : > { %v3570_v14 = vpop.eup %2906  ;;  %2922 = vpow2.f32 %v1227_v3  ;;  %v771_v18 = vpop.f32.mrb[12].mxu0  ;;  %v1237_v20 = vmul.f32 1.442695, %v1157_v10  ;;  %v1031_v24 = vsub.f32 %v920_v48, %v3528_v31  ;;  %v1158_v26 = vsub.f32 0.0, %v1094_v16 }
 0x108   : > { %v3573_v19 = vpop.eup %2908  ;;  %2924 = vpow2.f32 %v1233_v9  ;;  %v773_v25 = vpop.f32.mrb[13].mxu0  ;;  %v1235_v13 = vmul.f32 1.442695, %v1156_v15  ;;  %v1098_v27 = vmul.f32 %v1034_v17, %v1034_v17  ;;  %v1032_v28 = vsub.f32 %v922_v55, %v3530_v33 }
 0x109   : > { %v932_v32 = vpop.f32.mrb[12].mxu1  ;;  %v3577_v34 = vpop.eup %2910  ;;  %2926 = vpow2.f32 %v1237_v20  ;;  %v1161_v35 = vsub.f32 0.0, %v1097_v21  ;;  %v1095_v36 = vmul.f32 %v1031_v24, %v1031_v24  ;;  %v1035_v37 = vsub.f32 %v926_v6, %v3528_v31 }
 0x10a   : > { %v934_v39 = vpop.f32.mrb[13].mxu1  ;;  %v3580_v40 = vpop.eup %2912  ;;  %2928 = vpow2.f32 %v1235_v13  ;;  %v1239_v41 = vmul.f32 1.442695, %v1158_v26  ;;  %v1162_v42 = vsub.f32 0.0, %v1098_v27  ;;  %v1096_v43 = vmul.f32 %v1032_v28, %v1032_v28  ;;  %v2884_v13 = vld [vmem:[%s4237_s4 + $0x8] sm:$0xff]  }
 0x10b   : > { %v777_v44 = vpop.f32.mrb[14].mxu0  ;;  %v1245_v45 = vmul.f32 1.442695, %v1161_v35  ;;  %v1159_v46 = vsub.f32 0.0, %v1095_v36  ;;  %v1099_v47 = vmul.f32 %v1035_v37, %v1035_v37  ;;  %v1037_v48 = vsub.f32 %v771_v18, %v3524_v29  ;;  %v3583_v51 = vpop.eup %2914 }
 0x10c   : > { %v779_v50 = vpop.f32.mrb[15].mxu0  ;;  %2930 = vpow2.f32 %v1239_v41  ;;  %v1247_v52 = vmul.f32 1.442695, %v1162_v42  ;;  %v1160_v54 = vsub.f32 0.0, %v1096_v43  ;;  %v1036_v55 = vsub.f32 %v928_v12, %v3530_v33  ;;  %v938_v57 = vpop.f32.mrb[14].mxu1 }
 0x10d   : > { %2932 = vpow2.f32 %v1245_v45  ;;  %v1241_v59 = vmul.f32 1.442695, %v1159_v46  ;;  %v1163_v60 = vsub.f32 0.0, %v1099_v47  ;;  %v1101_v62 = vmul.f32 %v1037_v48, %v1037_v48  ;;  %v3588_v63 = vpop.f32.mrb[15].mxu1 }
 0x10e   : > { %v3586_v58 = vpop.eup %2916  ;;  %2934 = vpow2.f32 %v1247_v52  ;;  %v1243_v1 = vmul.f32 1.442695, %v1160_v54  ;;  %v1100_v3 = vmul.f32 %v1036_v55, %v1036_v55  ;;  %v1038_v4 = vsub.f32 %v773_v25, %v3526_v30 }
 0x10f   : > { %v3590_v0 = vpop.eup %2918  ;;  %v783_v5 = vpop.f32.mrb[16].mxu0  ;;  %2936 = vpow2.f32 %v1241_v59  ;;  %v1249_v9 = vmul.f32 1.442695, %v1163_v60  ;;  %v1165_v10 = vsub.f32 0.0, %v1101_v62  ;;  %v1393_v11 = vpack.c.bf16 %v3570_v14, %v3559_v56 }
 0x110   : > { %v3593_v6 = vpop.eup %2920  ;;  %v785_v12 = vpop.f32.mrb[17].mxu0  ;;  %2938 = vpow2.f32 %v1243_v1  ;;  %v1164_v16 = vsub.f32 0.0, %v1100_v3  ;;  %v1102_v17 = vmul.f32 %v1038_v4, %v1038_v4  ;;  %v1041_v18 = vsub.f32 %v777_v44, %v3524_v29 }
 0x111   : > { %v3597_v15 = vpop.eup %2922  ;;  %v3600_v20 = vpop.f32.mrb[16].mxu1  ;;  %2940 = vpow2.f32 %v1249_v9  ;;  %v1253_v24 = vmul.f32 1.442695, %v1165_v10  ;;  %1631 = vmatprep.mubr.bf16.mxu0 %v1393_v11  ;;  %v1392_v25 = vpack.c.bf16 %v3567_v8, %v3556_v49  ;;  %v1042_v56 = vsub.f32 %v779_v50, %v3526_v30  ;;  %v2885_v50 = vld [vmem:[%s4237_s4 + $0x10] sm:$0xff]  }
 0x112   : > { %v3602_v21 = vpop.eup %2924  ;;  %v3607_v14 = vpop.f32.mrb[17].mxu1  ;;  %v1251_v26 = vmul.f32 1.442695, %v1164_v16  ;;  %v1166_v27 = vsub.f32 0.0, %v1102_v17  ;;  %v1105_v28 = vmul.f32 %v1041_v18, %v1041_v18  ;;  %v1039_v35 = vsub.f32 %v932_v32, %v3528_v31 }
 0x113   : > { %v789_v36 = vpop.f32.mrb[18].mxu0  ;;  %v3613_v37 = vpop.eup %2926  ;;  %2942 = vpow2.f32 %v1253_v24  ;;  %1632 = vmatmul.mubr.bf16.vlgmr.msra.gmra.mrb[32].mxu0 %v1392_v25  ;;  %v1106_v41 = vmul.f32 %v1042_v56, %v1042_v56  ;;  %v1040_v49 = vsub.f32 %v934_v39, %v3530_v33  ;;  %v1395_v8 = vpack.c.bf16 %v3577_v34, %v3564_v2 }
 0x114   : > { %v791_v42 = vpop.f32.mrb[19].mxu0  ;;  %v3618_v43 = vpop.eup %2928  ;;  %2944 = vpow2.f32 %v1251_v26  ;;  %v1255_v44 = vmul.f32 1.442695, %v1166_v27  ;;  %v1169_v45 = vsub.f32 0.0, %v1105_v28  ;;  %2718 = vmatpush3.bf16.msra.mxu0 %v3517_v22  ;;  %v1103_v32 = vmul.f32 %v1039_v35, %v1039_v35 }
 0x115   : > { %v3621_v46 = vpop.f32.mrb[18].mxu1  ;;  %v1170_v47 = vsub.f32 0.0, %v1106_v41  ;;  %v1104_v48 = vmul.f32 %v1040_v49, %v1040_v49  ;;  %2583 = vmatprep.mubr.msk.bf16.mxu1 %vm1574_vm4, %v1395_v8  ;;  %v1043_v39 = vsub.f32 %v938_v57, %v3528_v31  ;;  %v1394_v2 = vpack.c.bf16 %v3573_v19, %v3562_v61  ;;  %2719 = vmatprep.subr.bf16.mxu0 %v2884_v13 }
 0x116   : > { %v3627_v34 = vpop.f32.mrb[19].mxu1  ;;  %v3632_v22 = vpop.eup %2930  ;;  %2946 = vpow2.f32 %v1255_v44  ;;  %v1261_v52 = vmul.f32 1.442695, %v1169_v45  ;;  %v1167_v54 = vsub.f32 0.0, %v1103_v32  ;;  %v1045_v55 = vsub.f32 %v783_v5, %v3524_v29 }
 0x117   : > { %v3635_v59 = vpop.f32.mrb[20].mxu0  ;;  %v3637_v57 = vpop.eup %2932  ;;  %v1263_v60 = vmul.f32 1.442695, %v1170_v47  ;;  %v1168_v61 = vsub.f32 0.0, %v1104_v48  ;;  %v1107_v19 = vmul.f32 %v1043_v39, %v1043_v39  ;;  %1729 = vmatmul.mubr.bf16.vlgmr.msra.gmra.mrb[32].mxu1 %v1394_v2  ;;  %v1044_v62 = vsub.f32 %v3588_v63, %v3530_v33  ;;  %v2886_v63 = vld [vmem:[%s4237_s4 + $0x18] sm:$0xff]  }
 0x118   : > { %v3641_v1 = vpop.f32.mrb[21].mxu0  ;;  %v3643_v3 = vpop.eup %2934  ;;  %2948 = vpow2.f32 %v1261_v52  ;;  %v1257_v4 = vmul.f32 1.442695, %v1167_v54  ;;  %v1109_v9 = vmul.f32 %v1045_v55, %v1045_v55  ;;  %v1046_v5 = vsub.f32 %v785_v12, %v3526_v30  ;;  %2720 = vmatpush3.bf16.msra.mxu0 %v2884_v13 }
 0x119   : > { %v3646_v10 = vpop.f32.mrb[20].mxu1  ;;  %v3648_v11 = vpop.eup %2936  ;;  %2950 = vpow2.f32 %v1263_v60  ;;  %v1259_v16 = vmul.f32 1.442695, %v1168_v61  ;;  %v1171_v17 = vsub.f32 0.0, %v1107_v19  ;;  %v1108_v18 = vmul.f32 %v1044_v62, %v1044_v62  ;;  %2721 = vmatprep.subr.bf16.mxu0 %v2885_v50 }
 0x11a   : > { %v3650_v24 = vpop.f32.mrb[21].mxu1  ;;  %v3655_v25 = vpop.eup %2938  ;;  %2952 = vpow2.f32 %v1257_v4  ;;  %v1173_v12 = vsub.f32 0.0, %v1109_v9  ;;  %v1110_v56 = vmul.f32 %v1046_v5, %v1046_v5  ;;  %v1397_v13 = vpack.c.bf16 %v3590_v0, %v3583_v51 }
 0x11b   : > { %v3659_v26 = vpop.f32.mrb[22].mxu0  ;;  %v3661_v27 = vpop.eup %2940  ;;  %2954 = vpow2.f32 %v1259_v16  ;;  %v1265_v28 = vmul.f32 1.442695, %v1171_v17  ;;  %v1172_v35 = vsub.f32 0.0, %v1108_v18  ;;  %v1049_v41 = vsub.f32 %v789_v36, %v3524_v29 }
 0x11c   : > { %v3664_v49 = vpop.f32.mrb[23].mxu0  ;;  %v1269_v8 = vmul.f32 1.442695, %v1173_v12  ;;  %v1174_v44 = vsub.f32 0.0, %v1110_v56  ;;  %1639 = vmatprep.mubr.bf16.mxu0 %v1397_v13  ;;  %v1396_v45 = vpack.c.bf16 %v3586_v58, %v3580_v40  ;;  %v1050_v32 = vsub.f32 %v791_v42, %v3526_v30  ;;  %v3669_v51 = vpop.f32.mrb[22].mxu1  ;;  %2722 = vmatpush3.bf16.msra.mxu0 %v2885_v50 }
 0x11d   : > { %v3671_v0 = vpop.eup %2942  ;;  %2956 = vpow2.f32 %v1265_v28  ;;  %v1267_v47 = vmul.f32 1.442695, %v1172_v35  ;;  %v1113_v48 = vmul.f32 %v1049_v41, %v1049_v41  ;;  %v1047_v36 = vsub.f32 %v3600_v20, %v3528_v31  ;;  %v3675_v39 = vpop.f32.mrb[23].mxu1  ;;  %2723 = vmatprep.subr.bf16.mxu0 %v2886_v63 }
 0x11e   : > { %v3677_v2 = vpop.eup %2944  ;;  %2958 = vpow2.f32 %v1269_v8  ;;  %v1271_v40 = vmul.f32 1.442695, %v1174_v44  ;;  %1640 = vmatmul.mubr.bf16.gmra.mrb[36].mxu0 %v1396_v45  ;;  %v1114_v58 = vmul.f32 %v1050_v32, %v1050_v32  ;;  %v1048_v42 = vsub.f32 %v3607_v14, %v3530_v33 }
 0x11f   : > { %v3681_v50 = vpop.f32.mrb[24].mxu0  ;;  %2960 = vpow2.f32 %v1267_v47  ;;  %v1177_v52 = vsub.f32 0.0, %v1113_v48  ;;  %v1111_v54 = vmul.f32 %v1047_v36, %v1047_v36  ;;  %v1399_v20 = vpack.c.bf16 %v3618_v43, %v3597_v15  ;;  %v3691_v4 = vpop.f32.mrb[24].mxu1 }
 0x120   : > { %v3685_v55 = vpop.f32.mrb[25].mxu0  ;;  %v3687_v60 = vpop.eup %2946  ;;  %2962 = vpow2.f32 %v1271_v40  ;;  %v1178_v61 = vsub.f32 0.0, %v1114_v58  ;;  %v1112_v19 = vmul.f32 %v1048_v42, %v1048_v42  ;;  %v1051_v62 = vsub.f32 %v3621_v46, %v3528_v31  ;;  %2724 = vmatpush3.bf16.msra.mxu0 %v2886_v63 }
 0x121   : > { %v1277_v14 = vmul.f32 1.442695, %v1177_v52  ;;  %v1175_v9 = vsub.f32 0.0, %v1111_v54  ;;  %2584 = vmatprep.mubr.msk.bf16.mxu1 %vm1574_vm4, %v1399_v20  ;;  %v1398_v15 = vpack.c.bf16 %v3602_v21, %v3593_v6  ;;  %v1053_v43 = vsub.f32 %v3635_v59, %v3524_v29  ;;  %v3698_v5 = vpop.f32.mrb[25].mxu1  ;;  %2795 = vmatprep.subr.msk.bf16.mxu0 %vm656_vm0, %v3537_v38 }
 0x122   : > { %v3702_v16 = vpop.eup %2948  ;;  %v1279_v46 = vmul.f32 1.442695, %v1178_v61  ;;  %v1176_v17 = vsub.f32 0.0, %v1112_v19  ;;  %v1115_v18 = vmul.f32 %v1051_v62, %v1051_v62  ;;  %v1052_v63 = vsub.f32 %v3627_v34, %v3530_v33 }
 0x123   : > { %v3706_v12 = vpop.f32.mrb[26].mxu0  ;;  %v3708_v56 = vpop.eup %2950  ;;  %2964 = vpow2.f32 %v1277_v14  ;;  %v1273_v6 = vmul.f32 1.442695, %v1175_v9  ;;  %1737 = vmatmul.mubr.bf16.gmra.mrb[36].mxu1 %v1398_v15  ;;  %v1117_v21 = vmul.f32 %v1053_v43, %v1053_v43  ;;  %v1054_v59 = vsub.f32 %v3641_v1, %v3526_v30 }
 0x124   : > { %v3712_v38 = vpop.f32.mrb[27].mxu0  ;;  %v3714_v13 = vpop.eup %2952  ;;  %2966 = vpow2.f32 %v1279_v46  ;;  %v1275_v28 = vmul.f32 1.442695, %v1176_v17  ;;  %v1179_v35 = vsub.f32 0.0, %v1115_v18  ;;  %v1116_v41 = vmul.f32 %v1052_v63, %v1052_v63  ;;  %2726 = vmatpush3.bf16.msra.mxu0 %v3545_v53 }
 0x125   : > { %v3716_v34 = vpop.f32.mrb[26].mxu1  ;;  %v3719_v8 = vpop.eup %2954  ;;  %2968 = vpow2.f32 %v1273_v6  ;;  %v1181_v44 = vsub.f32 0.0, %v1117_v21  ;;  %v1118_v45 = vmul.f32 %v1054_v59, %v1054_v59  ;;  %v1401_v1 = vpack.c.bf16 %v3643_v3, %v3632_v22 }
 0x126   : > { %v3723_v32 = vpop.f32.mrb[27].mxu1  ;;  %2970 = vpow2.f32 %v1275_v28  ;;  %v1281_v47 = vmul.f32 1.442695, %v1179_v35  ;;  %v1180_v48 = vsub.f32 0.0, %v1116_v41  ;;  %v1057_v36 = vsub.f32 %v3659_v26, %v3524_v29 }
 0x127   : > { %v3727_v40 = vpop.f32.mrb[28].mxu0  ;;  %v3729_v58 = vpop.eup %2956  ;;  %v1285_v53 = vmul.f32 1.442695, %v1181_v44  ;;  %v1182_v42 = vsub.f32 0.0, %v1118_v45  ;;  %1647 = vmatprep.mubr.bf16.mxu0 %v1401_v1  ;;  %v1400_v52 = vpack.c.bf16 %v3637_v57, %v3613_v37  ;;  %v1058_v22 = vsub.f32 %v3664_v49, %v3526_v30 }
 0x128   : > { %v3735_v3 = vpop.f32.mrb[29].mxu0  ;;  %v3737_v54 = vpop.eup %2958  ;;  %2972 = vpow2.f32 %v1281_v47  ;;  %v1283_v20 = vmul.f32 1.442695, %v1180_v48  ;;  %v1121_v26 = vmul.f32 %v1057_v36, %v1057_v36  ;;  %v1055_v61 = vsub.f32 %v3646_v10, %v3528_v31 }
 0x129   : > { %v3741_v19 = vpop.f32.mrb[28].mxu1  ;;  %v3743_v62 = vpop.eup %2960  ;;  %2974 = vpow2.f32 %v1285_v53  ;;  %v1287_v14 = vmul.f32 1.442695, %v1182_v42  ;;  %1648 = vmatmul.mubr.bf16.gmra.mrb[40].mxu0 %v1400_v52  ;;  %v1122_v37 = vmul.f32 %v1058_v22, %v1058_v22  ;;  %v1056_v57 = vsub.f32 %v3650_v24, %v3530_v33 }
 0x12a   : > { %v3747_v49 = vpop.f32.mrb[29].mxu1  ;;  %v3749_v9 = vpop.eup %2962  ;;  %2976 = vpow2.f32 %v1283_v20  ;;  %v1185_v15 = vsub.f32 0.0, %v1121_v26  ;;  %v1119_v43 = vmul.f32 %v1055_v61, %v1055_v61  ;;  %v1403_v10 = vpack.c.bf16 %v3677_v2, %v3655_v25 }
 0x12b   : > { %v3753_v46 = vpop.f32.mrb[30].mxu0  ;;  %2978 = vpow2.f32 %v1287_v14  ;;  %v1186_v17 = vsub.f32 0.0, %v1122_v37  ;;  %v1120_v18 = vmul.f32 %v1056_v57, %v1056_v57  ;;  %v1059_v63 = vsub.f32 %v3669_v51, %v3528_v31  ;;  %v3764_v2 = vpop.f32.mrb[30].mxu1 }
 0x12c   : > { %v3757_v6 = vpop.f32.mrb[31].mxu0  ;;  %v1293_v24 = vmul.f32 1.442695, %v1185_v15  ;;  %v1183_v21 = vsub.f32 0.0, %v1119_v43  ;;  %2585 = vmatprep.mubr.msk.bf16.mxu1 %vm1574_vm4, %v1403_v10  ;;  %v1402_v59 = vpack.c.bf16 %v3661_v27, %v3648_v11  ;;  %v1061_v25 = vsub.f32 %v3681_v50, %v3524_v29  ;;  %v3770_v45 = vpop.f32.mrb[31].mxu1 }
 0x12d   : > { %v3766_v28 = vpop.eup %2964  ;;  %v1295_v35 = vmul.f32 1.442695, %v1186_v17  ;;  %v1184_v41 = vsub.f32 0.0, %v1120_v18  ;;  %v1123_v44 = vmul.f32 %v1059_v63, %v1059_v63  ;;  %v1060_v51 = vsub.f32 %v3675_v39, %v3530_v33 }
 0x12e   : > { %v3772_v1 = vpop.eup %2966  ;;  %2980 = vpow2.f32 %v1293_v24  ;;  %v1289_v47 = vmul.f32 1.442695, %v1183_v21  ;;  %1745 = vmatmul.mubr.bf16.gmra.mrb[40].mxu1 %v1402_v59  ;;  %v1125_v11 = vmul.f32 %v1061_v25, %v1061_v25  ;;  %v1062_v27 = vsub.f32 %v3685_v55, %v3526_v30 }
 0x12f   : > { %v3776_v50 = vpop.eup %2968  ;;  %2982 = vpow2.f32 %v1295_v35  ;;  %v1291_v48 = vmul.f32 1.442695, %v1184_v41  ;;  %v1187_v36 = vsub.f32 0.0, %v1123_v44  ;;  %v1124_v53 = vmul.f32 %v1060_v51, %v1060_v51 }
 0x130   : > { %v3778_v42 = vpop.eup %2970  ;;  %2984 = vpow2.f32 %v1289_v47  ;;  %v1189_v39 = vsub.f32 0.0, %v1125_v11  ;;  %v1126_v52 = vmul.f32 %v1062_v27, %v1062_v27  ;;  %v1405_v22 = vpack.c.bf16 %v3708_v56, %v3687_v60 }
 0x131   : > { %2986 = vpow2.f32 %v1291_v48  ;;  %v1297_v20 = vmul.f32 1.442695, %v1187_v36  ;;  %v1188_v26 = vsub.f32 0.0, %v1124_v53  ;;  %v1065_v55 = vsub.f32 %v3706_v12, %v3524_v29 }
 0x132   : > { %v3784_v61 = vpop.eup %2972  ;;  %v1301_v14 = vmul.f32 1.442695, %v1189_v39  ;;  %v1190_v37 = vsub.f32 0.0, %v1126_v52  ;;  %1655 = vmatprep.mubr.bf16.mxu0 %v1405_v22  ;;  %v1404_v57 = vpack.c.bf16 %v3702_v16, %v3671_v0  ;;  %v1066_v15 = vsub.f32 %v3712_v38, %v3526_v30 }
 0x133   : > { %v3790_v43 = vpop.eup %2974  ;;  %2988 = vpow2.f32 %v1297_v20  ;;  %v1299_v60 = vmul.f32 1.442695, %v1188_v26  ;;  %v1129_v56 = vmul.f32 %v1065_v55, %v1065_v55  ;;  %v1063_v10 = vsub.f32 %v3691_v4, %v3528_v31 }
 0x134   : > { %v3794_v12 = vpop.eup %2976  ;;  %2990 = vpow2.f32 %v1301_v14  ;;  %v1303_v17 = vmul.f32 1.442695, %v1190_v37  ;;  %1656 = vmatmul.mubr.bf16.gmra.mrb[44].mxu0 %v1404_v57  ;;  %v1130_v18 = vmul.f32 %v1066_v15, %v1066_v15  ;;  %v1064_v0 = vsub.f32 %v3698_v5, %v3530_v33 }
 0x135   : > { %v3798_v16 = vpop.eup %2978  ;;  %2992 = vpow2.f32 %v1299_v60  ;;  %v1193_v38 = vsub.f32 0.0, %v1129_v56  ;;  %v1127_v63 = vmul.f32 %v1063_v10, %v1063_v10  ;;  %v1407_v24 = vpack.c.bf16 %v3743_v62, %v3719_v8 }
 0x136   : > { %2994 = vpow2.f32 %v1303_v17  ;;  %v1194_v21 = vsub.f32 0.0, %v1130_v18  ;;  %v1128_v4 = vmul.f32 %v1064_v0, %v1064_v0  ;;  %v1067_v59 = vsub.f32 %v3716_v34, %v3528_v31  ;;  %v3841_v0 = vpop.permute.xlu1 %494 }
 0x137   : > { %v1309_v25 = vmul.f32 1.442695, %v1193_v38  ;;  %v1191_v35 = vsub.f32 0.0, %v1127_v63  ;;  %2586 = vmatprep.mubr.msk.bf16.mxu1 %vm1574_vm4, %v1407_v24  ;;  %v1406_v5 = vpack.c.bf16 %v3729_v58, %v3714_v13  ;;  %v1069_v41 = vsub.f32 %v3727_v40, %v3524_v29  ;;  %v489_v38 = vpop.permute.xlu0 %488 }
 0x138   : > { %v3809_v44 = vpop.eup %2980  ;;  %v1311_v51 = vmul.f32 1.442695, %v1194_v21  ;;  %v1192_v8 = vsub.f32 0.0, %v1128_v4  ;;  %v1131_v62 = vmul.f32 %v1067_v59, %v1067_v59  ;;  %v1068_v47 = vsub.f32 %v3723_v32, %v3530_v33 }
 0x139   : > { %v3813_v11 = vpop.eup %2982  ;;  %2996 = vpow2.f32 %v1309_v25  ;;  %v1305_v34 = vmul.f32 1.442695, %v1191_v35  ;;  %1753 = vmatmul.mubr.bf16.gmra.mrb[44].mxu1 %v1406_v5  ;;  %v1133_v27 = vmul.f32 %v1069_v41, %v1069_v41  ;;  %v1070_v13 = vsub.f32 %v3735_v3, %v3526_v30 }
 0x13a   : > { %v3817_v58 = vpop.eup %2984  ;;  %2998 = vpow2.f32 %v1311_v51  ;;  %v1307_v40 = vmul.f32 1.442695, %v1192_v8  ;;  %v1195_v48 = vsub.f32 0.0, %v1131_v62  ;;  %v1132_v36 = vmul.f32 %v1068_v47, %v1068_v47  ;;  %v498_v47 = vpop.permute.xlu1 %497 }
 0x13b   : > { %v3819_v53 = vpop.eup %2986  ;;  %3000 = vpow2.f32 %v1305_v34  ;;  %v1197_v39 = vsub.f32 0.0, %v1133_v27  ;;  %v1134_v32 = vmul.f32 %v1070_v13, %v1070_v13  ;;  %v1409_v52 = vpack.c.bf16 %v3772_v1, %v3749_v9 }
 0x13c   : > { %3002 = vpow2.f32 %v1307_v40  ;;  %v1313_v22 = vmul.f32 1.442695, %v1195_v48  ;;  %v1196_v20 = vsub.f32 0.0, %v1132_v36  ;;  %v1073_v3 = vsub.f32 %v3753_v46, %v3524_v29 }
 0x13d   : > { %v3825_v26 = vpop.eup %2988  ;;  %v1317_v55 = vmul.f32 1.442695, %v1197_v39  ;;  %v1198_v14 = vsub.f32 0.0, %v1134_v32  ;;  %1663 = vmatprep.mubr.bf16.mxu0 %v1409_v52  ;;  %v1408_v37 = vpack.c.bf16 %v3766_v28, %v3737_v54  ;;  %v1074_v57 = vsub.f32 %v3757_v6, %v3526_v30 }
 0x13e   : > { %v3831_v15 = vpop.eup %2990  ;;  %3004 = vpow2.f32 %v1313_v22  ;;  %v1315_v9 = vmul.f32 1.442695, %v1196_v20  ;;  %v1137_v1 = vmul.f32 %v1073_v3, %v1073_v3  ;;  %v1071_v60 = vsub.f32 %v3741_v19, %v3528_v31  ;;  %v504_v39 = vpop.permute.xlu1 %503 }
 0x13f   : > { %v2993_v29 = vpop.eup %2992  ;;  %3006 = vpow2.f32 %v1317_v55  ;;  %v1319_v46 = vmul.f32 1.442695, %v1198_v14  ;;  %1664 = vmatmul.mubr.bf16.gmra.mrb[48].mxu0 %v1408_v37  ;;  %v1138_v56 = vmul.f32 %v1074_v57, %v1074_v57  ;;  %v1072_v10 = vsub.f32 %v3747_v49, %v3530_v33 }
 0x140   : > { %v2995_v54 = vpop.eup %2994  ;;  %3008 = vpow2.f32 %v1315_v9  ;;  %v1201_v28 = vsub.f32 0.0, %v1137_v1  ;;  %v1135_v30 = vmul.f32 %v1071_v60, %v1071_v60  ;;  %v1411_v6 = vpack.c.bf16 %v3794_v12, %v3778_v42 }
 0x141   : > { %3010 = vpow2.f32 %v1319_v46  ;;  %v1202_v17 = vsub.f32 0.0, %v1138_v56  ;;  %v1136_v18 = vmul.f32 %v1072_v10, %v1072_v10  ;;  %v1075_v19 = vsub.f32 %v3764_v2, %v3528_v31 }
 0x142   : > { %v1325_v63 = vmul.f32 1.442695, %v1201_v28  ;;  %v1199_v24 = vsub.f32 0.0, %v1135_v30  ;;  %2587 = vmatprep.mubr.msk.bf16.mxu1 %vm1574_vm4, %v1411_v6  ;;  %v1410_v49 = vpack.c.bf16 %v3784_v61, %v3776_v50  ;;  %v1076_v21 = vsub.f32 %v3770_v45, %v3530_v33 }
 0x143   : > { %v2997_v42 = vpop.eup %2996  ;;  %v1327_v12 = vmul.f32 1.442695, %v1202_v17  ;;  %v1200_v4 = vsub.f32 0.0, %v1136_v18  ;;  %v1139_v59 = vmul.f32 %v1075_v19, %v1075_v19  ;;  %v1413_v31 = vpack.c.bf16 %v3813_v11, %v3798_v16  ;;  %v492_v11 = vpop.permute.xlu0 %491 }
 0x144   : > { %v2999_v2 = vpop.eup %2998  ;;  %3012 = vpow2.f32 %v1325_v63  ;;  %v1321_v25 = vmul.f32 1.442695, %v1199_v24  ;;  %1761 = vmatmul.mubr.bf16.gmra.mrb[48].mxu1 %v1410_v49  ;;  %v1140_v35 = vmul.f32 %v1076_v21, %v1076_v21  ;;  %v1412_v5 = vpack.c.bf16 %v3809_v44, %v3790_v43 }
 0x145   : > { %v3001_v41 = vpop.eup %3000  ;;  %3014 = vpow2.f32 %v1327_v12  ;;  %v1323_v50 = vmul.f32 1.442695, %v1200_v4  ;;  %v1203_v61 = vsub.f32 0.0, %v1139_v59  ;;  %1671 = vmatprep.mubr.bf16.mxu0 %v1413_v31  ;;  %v1415_v33 = vpack.c.bf16 %v2993_v29, %v3819_v53 }
 0x146   : > { %v3003_v45 = vpop.eup %3002  ;;  %v1204_v51 = vsub.f32 0.0, %v1140_v35  ;;  %v1414_v16 = vpack.c.bf16 %v3825_v26, %v3817_v58  ;;  %v1417_v8 = vpack.c.bf16 %v2999_v2, %v2995_v54  ;;  %3016 = vpow2.f32 %v1321_v25 }
 0x147   : > { %v1329_v62 = vmul.f32 1.442695, %v1203_v61  ;;  %1672 = vmatmul.mubr.bf16.gmra.mrb[52].mxu0 %v1412_v5  ;;  %2588 = vmatprep.mubr.msk.bf16.mxu1 %vm1574_vm4, %v1415_v33  ;;  %v1416_v43 = vpack.c.bf16 %v2997_v42, %v3831_v15  ;;  %3018 = vpow2.f32 %v1323_v50  ;;  %v3858_v58 = vand.u32 127, %v485_v23  ;;  %v501_v32 = vpop.permute.xlu0 %500  ;;  %v510_v15 = vpop.permute.xlu1 %509 }
 0x148   : > { %v3005_v44 = vpop.eup %3004  ;;  %v1331_v34 = vmul.f32 1.442695, %v1204_v51  ;;  %1679 = vmatprep.mubr.bf16.mxu0 %v1417_v8 }
 0x149   : > { %v3007_v27 = vpop.eup %3006  ;;  %3020 = vpow2.f32 %v1329_v62  ;;  %v1418_v13 = vpack.c.bf16 %v3005_v44, %v3001_v41  ;;  %vm535_vm5 = vcmp.eq.s32.totalorder %v3858_v58, %v489_v38  ;;  %vm536_vm6 = vcmp.eq.s32.totalorder %v3858_v58, %v492_v11 }
 0x14a   : > { %v3009_v40 = vpop.eup %3008  ;;  %3022 = vpow2.f32 %v1331_v34  ;;  %v2506_v23 = vsel %vm535_vm5, 1.0, %v3136_v7  ;;  %v2507_v26 = vsel %vm536_vm6, 1.0, %v3136_v7  ;;  %vm537_vm8 = vcmp.eq.s32.totalorder %v3858_v58, %v3841_v0 }
 0x14b   : > { %v3011_v48 = vpop.eup %3010  ;;  %v1419_v36 = vpack.c.bf16 %v3009_v40, %v3003_v45  ;;  %v583_v57 = vpack.c.bf16 %v2507_v26, %v2506_v23  ;;  %v507_v9 = vpop.permute.xlu0 %506  ;;  %vm538_vm9 = vcmp.eq.s32.totalorder %v3858_v58, %v498_v47  ;;  %vm540_vm10 = vcmp.eq.s32.totalorder %v3858_v58, %v504_v39 }
 0x14c   : > { %1769 = vmatmul.mubr.bf16.gmra.mrb[52].mxu1 %v1414_v16  ;;  %vm539_vm11 = vcmp.eq.s32.totalorder %v3858_v58, %v501_v32  ;;  %v2508_v29 = vsel %vm537_vm8, 1.0, %v3136_v7  ;;  %v2509_v46 = vsel %vm538_vm9, 1.0, %v3136_v7  ;;  %v516_v56 = vpop.permute.xlu1 %515  ;;  %v2511_v54 = vsel %vm540_vm10, 1.0, %v3136_v7 }
 0x14d   : > { %2589 = vmatprep.mubr.msk.bf16.mxu1 %vm1574_vm4, %v1419_v36  ;;  %v2510_v28 = vsel %vm539_vm11, 1.0, %v3136_v7  ;;  %v584_v30 = vpack.c.bf16 %v2509_v46, %v2508_v29  ;;  %vm542_vm12 = vcmp.eq.s32.totalorder %v3858_v58, %v510_v15  ;;  %vm541_vm13 = vcmp.eq.s32.totalorder %v3858_v58, %v507_v9 }
 0x14e   : > { %v3013_v53 = vpop.eup %3012  ;;  %v585_v6 = vpack.c.bf16 %v2511_v54, %v2510_v28  ;;  %vm544_vm14 = vcmp.eq.s32.totalorder %v3858_v58, %v516_v56  ;;  %v2513_v19 = vsel %vm542_vm12, 1.0, %v3136_v7  ;;  %v2512_v0 = vsel %vm541_vm13, 1.0, %v3136_v7 }
 0x14f   : > { %v3015_v52 = vpop.eup %3014  ;;  %1680 = vmatmul.mubr.bf16.gmra.mrb[56].mxu0 %v1416_v43  ;;  %v1420_v22 = vpack.c.bf16 %v3013_v53, %v3007_v27  ;;  %v513_v10 = vpop.permute.xlu0 %512  ;;  %v2515_v38 = vsel %vm544_vm14, 1.0, %v3136_v7  ;;  %v586_v24 = vpack.c.bf16 %v2513_v19, %v2512_v0 }
 0x150   : > { %v1421_v20 = vpack.c.bf16 %v3015_v52, %v3011_v48  ;;  %v3017_v3 = vpop.eup %3016  ;;  %vm543_vm15 = vcmp.eq.s32.totalorder %v3858_v58, %v513_v10  ;;  %v522_v17 = vpop.permute.xlu1 %521 }
 0x151   : > { %v3019_v55 = vpop.eup %3018  ;;  %v2514_v63 = vsel %vm543_vm15, 1.0, %v3136_v7  ;;  %vm546_vm0 = vcmp.eq.s32.totalorder %v3858_v58, %v522_v17 }
 0x152   : > { %1687 = vmatprep.mubr.bf16.mxu0 %v1421_v20  ;;  %v587_v49 = vpack.c.bf16 %v2515_v38, %v2514_v63  ;;  %v2517_v12 = vsel %vm546_vm0, 1.0, %v3136_v7 }
 0x153   : > { %v3021_v14 = vpop.eup %3020  ;;  %v519_v18 = vpop.permute.xlu0 %518 }
 0x154   : > { %v3023_v37 = vpop.eup %3022  ;;  %1777 = vmatmul.mubr.bf16.gmra.mrb[56].mxu1 %v1418_v13  ;;  %v1422_v1 = vpack.c.bf16 %v3021_v14, %v3017_v3  ;;  %v528_v21 = vpop.permute.xlu1 %527  ;;  %vm545_vm1 = vcmp.eq.s32.totalorder %v3858_v58, %v519_v18 }
 0x155   : > { %v1423_v60 = vpack.c.bf16 %v3023_v37, %v3019_v55  ;;  %vm548_vm2 = vcmp.eq.s32.totalorder %v3858_v58, %v528_v21  ;;  %v2516_v4 = vsel %vm545_vm1, 1.0, %v3136_v7 }
 0x156   : > { %v2519_v59 = vsel %vm548_vm2, 1.0, %v3136_v7  ;;  %v588_v35 = vpack.c.bf16 %v2517_v12, %v2516_v4 }
 0x157   : > { %1688 = vmatmul.mubr.bf16.gmra.mrb[60].mxu0 %v1420_v22  ;;  %2590 = vmatprep.mubr.msk.bf16.mxu1 %vm1574_vm4, %v1423_v60  ;;  %v525_v42 = vpop.permute.xlu0 %524 }
 0x158   : > { %2727 = vmatprep.mubr.msk.bf16.mxu0 %vm1820_vm7, %v583_v57  ;;  %vm547_vm3 = vcmp.eq.s32.totalorder %v3858_v58, %v525_v42  ;;  %v534_v2 = vpop.permute.xlu1 %533 }
 0x159   : > { %v2518_v31 = vsel %vm547_vm3, 1.0, %v3136_v7  ;;  %vm550_vm4 = vcmp.eq.s32.totalorder %v3858_v58, %v534_v2 }
 0x15a   : > { %v589_v5 = vpack.c.bf16 %v2519_v59, %v2518_v31  ;;  %v2521_v41 = vsel %vm550_vm4, 1.0, %v3136_v7 }
 0x15b   : > { %v531_v25 = vpop.permute.xlu0 %530 }
 0x15c   : > { %1785 = vmatmul.mubr.bf16.gmra.mrb[60].mxu1 %v1422_v1  ;;  %vm549_vm5 = vcmp.eq.s32.totalorder %v3858_v58, %v531_v25 }
 0x15d   : > { %v2520_v50 = vsel %vm549_vm5, 1.0, %v3136_v7 }
 0x15e   : > { %v590_v61 = vpack.c.bf16 %v2521_v41, %v2520_v50 }
 0x15f   : > { %2728 = vmatmul.mubr.msk.bf16.vlgmr.msra.gmra.mrb[64].mxu0 %vm1820_vm7, %v584_v30 }
 0x160   : > { %2731 = vmatprep.mubr.msk.bf16.mxu0 %vm1820_vm7, %v585_v6 }
 0x167   : > { %2732 = vmatmul.mubr.msk.bf16.gmra.mrb[68].mxu0 %vm1820_vm7, %v586_v24 }
 0x168   : > { %2735 = vmatprep.mubr.msk.bf16.mxu0 %vm1820_vm7, %v587_v49 }
 0x16f   : > { %2736 = vmatmul.mubr.msk.bf16.gmra.mrb[72].mxu0 %vm1820_vm7, %v588_v35 }
 0x170   : > { %2739 = vmatprep.mubr.msk.bf16.mxu0 %vm1820_vm7, %v589_v5 }
 0x177   : > { %2740 = vmatmul.mubr.msk.bf16.gmra.mrb[76].mxu0 %vm1820_vm7, %v590_v61 }
 0x1e6   : > { %v2640_v33 = vpop.f32.mrb[32].mxu0 }
 0x1e7   : > { %v2641_v45 = vpop.f32.mrb[33].mxu0 }
 0x1e8   : > { %v2642_v51 = vadd.f32 %v2641_v45, %v2640_v33  ;;  %v2643_v16 = vpop.f32.mrb[34].mxu0 }
 0x1e9   : > { %v2644_v8 = vpop.f32.mrb[35].mxu0 }
 0x1ea   : > { %v2645_v62 = vadd.f32 %v2644_v8, %v2643_v16  ;;  %v1730_v43 = vpop.f32.mrb[32].mxu1 }
 0x1eb   : > { %v3903_v44 = vadd.f32 %v2642_v51, %v1730_v43  ;;  %v1732_v47 = vpop.f32.mrb[33].mxu1 }
 0x1ec   : > { %v1733_v11 = vpop.f32.mrb[34].mxu1 }
 0x1ed   : > { %v3905_v34 = vadd.f32 %v2645_v62, %v1733_v11  ;;  %v1735_v27 = vpop.f32.mrb[35].mxu1 }
 0x1f1   : > { %v2646_v13 = vpop.f32.mrb[36].mxu0 }
 0x1f2   : > { %v2647_v40 = vpop.f32.mrb[37].mxu0 }
 0x1f3   : > { %v2648_v7 = vadd.f32 %v2647_v40, %v2646_v13  ;;  %v2649_v58 = vpop.f32.mrb[38].mxu0 }
 0x1f4   : > { %v2650_v48 = vpop.f32.mrb[39].mxu0 }
 0x1f5   : > { %v2651_v36 = vadd.f32 %v2650_v48, %v2649_v58 }
 0x1f6   : > { %v1738_v53 = vpop.f32.mrb[36].mxu1 }
 0x1f7   : > { %v3907_v39 = vadd.f32 %v2648_v7, %v1738_v53  ;;  %v1740_v32 = vpop.f32.mrb[37].mxu1 }
 0x1f8   : > { %v1741_v52 = vpop.f32.mrb[38].mxu1 }
 0x1f9   : > { %v3909_v22 = vadd.f32 %v2651_v36, %v1741_v52  ;;  %v1743_v20 = vpop.f32.mrb[39].mxu1 }
 0x1fc   : > { %v2652_v3 = vpop.f32.mrb[40].mxu0 }
 0x1fd   : > { %v2653_v23 = vpop.f32.mrb[41].mxu0 }
 0x1fe   : > { %v2654_v26 = vadd.f32 %v2653_v23, %v2652_v3  ;;  %v2655_v55 = vpop.f32.mrb[42].mxu0 }
 0x1ff   : > { %v2656_v14 = vpop.f32.mrb[43].mxu0 }
 0x200   : > { %v2657_v37 = vadd.f32 %v2656_v14, %v2655_v55 }
 0x201   : > { %v1746_v57 = vpop.f32.mrb[40].mxu1 }
 0x202   : > { %v3911_v15 = vadd.f32 %v2654_v26, %v1746_v57  ;;  %v1748_v9 = vpop.f32.mrb[41].mxu1 }
 0x203   : > { %v1749_v1 = vpop.f32.mrb[42].mxu1 }
 0x204   : > { %v3913_v60 = vadd.f32 %v2657_v37, %v1749_v1  ;;  %v1751_v29 = vpop.f32.mrb[43].mxu1 }
 0x207   : > { %v2658_v46 = vpop.f32.mrb[44].mxu0 }
 0x208   : > { %v2659_v56 = vpop.f32.mrb[45].mxu0 }
 0x209   : > { %v2660_v10 = vadd.f32 %v2659_v56, %v2658_v46  ;;  %v2661_v54 = vpop.f32.mrb[46].mxu0 }
 0x20a   : > { %v2662_v28 = vpop.f32.mrb[47].mxu0 }
 0x20b   : > { %v2663_v30 = vadd.f32 %v2662_v28, %v2661_v54 }
 0x20c   : > { %v1754_v6 = vpop.f32.mrb[44].mxu1 }
 0x20d   : > { %v3915_v17 = vadd.f32 %v2660_v10, %v1754_v6  ;;  %v1756_v18 = vpop.f32.mrb[45].mxu1 }
 0x20e   : > { %v1757_v19 = vpop.f32.mrb[46].mxu1 }
 0x20f   : > { %v3917_v0 = vadd.f32 %v2663_v30, %v1757_v19  ;;  %v1759_v38 = vpop.f32.mrb[47].mxu1  ;;  %v2604_v30 = vld [vmem:[%s4238_s5] ss:$0 sm:$0xff] }
 0x212   : > { %v2664_v63 = vpop.f32.mrb[48].mxu0 }
 0x213   : > { %v2665_v24 = vpop.f32.mrb[49].mxu0 }
 0x214   : > { %v2666_v49 = vadd.f32 %v2665_v24, %v2664_v63  ;;  %v2667_v21 = vpop.f32.mrb[50].mxu0 }
 0x215   : > { %v2668_v42 = vpop.f32.mrb[51].mxu0 }
 0x216   : > { %v2669_v12 = vadd.f32 %v2668_v42, %v2667_v21 }
 0x217   : > { %v1762_v4 = vpop.f32.mrb[48].mxu1 }
 0x218   : > { %v3919_v59 = vadd.f32 %v2666_v49, %v1762_v4  ;;  %v1764_v31 = vpop.f32.mrb[49].mxu1 }
 0x219   : > { %v1765_v2 = vpop.f32.mrb[50].mxu1 }
 0x21a   : > { %v3921_v25 = vadd.f32 %v2669_v12, %v1765_v2  ;;  %v2670_v35 = vpop.f32.mrb[52].mxu0  ;;  %v1767_v5 = vpop.f32.mrb[51].mxu1 }
 0x21b   : > { %v2671_v41 = vpop.f32.mrb[53].mxu0 }
 0x21c   : > { %v2672_v50 = vadd.f32 %v2671_v41, %v2670_v35  ;;  %v2673_v61 = vpop.f32.mrb[54].mxu0 }
 0x21d   : > { %v2674_v33 = vpop.f32.mrb[55].mxu0 }
 0x21e   : > { %v2675_v45 = vadd.f32 %v2674_v33, %v2673_v61 }
 0x21f   : > { %v1770_v51 = vpop.f32.mrb[52].mxu1 }
 0x220   : > { %v1771_v16 = vadd.f32 %v2672_v50, %v1770_v51  ;;  %v1772_v8 = vpop.f32.mrb[53].mxu1 }
 0x221   : > { %v1773_v62 = vpop.f32.mrb[54].mxu1 }
 0x222   : > { %v1774_v43 = vadd.f32 %v2675_v45, %v1773_v62  ;;  %v2676_v47 = vpop.f32.mrb[56].mxu0  ;;  %v1775_v11 = vpop.f32.mrb[55].mxu1 }
 0x223   : > { %v2677_v27 = vpop.f32.mrb[57].mxu0 }
 0x224   : > { %v2678_v13 = vadd.f32 %v2677_v27, %v2676_v47  ;;  %v2679_v40 = vpop.f32.mrb[58].mxu0 }
 0x225   : > { %v2680_v7 = vpop.f32.mrb[59].mxu0 }
 0x226   : > { %v2681_v58 = vadd.f32 %v2680_v7, %v2679_v40 }
 0x227   : > { %v1778_v48 = vpop.f32.mrb[56].mxu1 }
 0x228   : > { %v3923_v36 = vadd.f32 %v2678_v13, %v1778_v48  ;;  %v1780_v53 = vpop.f32.mrb[57].mxu1 }
 0x229   : > { %v1781_v32 = vpop.f32.mrb[58].mxu1 }
 0x22a   : > { %v3925_v52 = vadd.f32 %v2681_v58, %v1781_v32  ;;  %v2682_v20 = vpop.f32.mrb[60].mxu0  ;;  %v1783_v3 = vpop.f32.mrb[59].mxu1  ;;  %v2888_v32 = vld [vmem:[%s4242_s9] sm:$0xff]  }
 0x22b   : > { %v2683_v23 = vpop.f32.mrb[61].mxu0  ;;  %2743 = vmatprep.subr.bf16.mxu1 %v2888_v32  ;;  %v2891_v3 = vld [vmem:[%s4242_s9 + $0x18] sm:$0xff]  }
 0x22c   : > { %v2684_v26 = vadd.f32 %v2683_v23, %v2682_v20  ;;  %v2685_v55 = vpop.f32.mrb[62].mxu0  ;;  %2744 = vmatpush3.bf16.msra.mxu1 %v2888_v32  ;;  %v2890_v20 = vld [vmem:[%s4242_s9 + $0x10] sm:$0xff]   ;;  %v2892_v23 = vld [vmem:[%s4242_s9 + $0x20] sm:$0xff]  }
 0x22d   : > { %v2686_v14 = vpop.f32.mrb[63].mxu0 }
 0x22e   : > { %v2687_v37 = vadd.f32 %v2686_v14, %v2685_v55 }
 0x22f   : > { %v1786_v57 = vpop.f32.mrb[60].mxu1 }
 0x230   : > { %v1787_v9 = vadd.f32 %v2684_v26, %v1786_v57  ;;  %v1788_v1 = vpop.f32.mrb[61].mxu1 }
 0x231   : > { %v1789_v29 = vpop.f32.mrb[62].mxu1 }
 0x232   : > { %v1790_v46 = vadd.f32 %v2687_v37, %v1789_v29  ;;  %v2729_v56 = vpop.f32.mrb[64].mxu0  ;;  %v1791_v10 = vpop.f32.mrb[63].mxu1 }
 0x233   : > { %v1891_v54 = vadd.f32 %v2729_v56, %v3907_v39  ;;  %v1882_v28 = vpop.f32.mrb[65].mxu0 }
 0x234   : > { %v1883_v6 = vadd.f32 %v1882_v28, %v3903_v44  ;;  %v2730_v18 = vpop.f32.mrb[66].mxu0 }
 0x235   : > { %v1894_v19 = vadd.f32 %v2730_v18, %v3909_v22  ;;  %v1885_v38 = vpop.f32.mrb[67].mxu0  ;;  %v3940_v21 = vadd.f32 %v2604_v30, %v1891_v54 }
 0x236   : > { %v1886_v63 = vadd.f32 %v1885_v38, %v3905_v34  ;;  %v3934_v24 = vadd.f32 %v2604_v30, %v1883_v6 }
 0x237   : > { %v3947_v2 = vadd.f32 %v2604_v30, %v1894_v19 }
 0x238   : > { %1970 = vadd.xlane.f32.xlu0 %v3934_v24  ;;  %v3937_v49 = vadd.f32 %v2604_v30, %v1886_v63 }
 0x23a   : > { %1972 = vadd.xlane.f32.xlu1 %v3937_v49  ;;  %v2733_v39 = vpop.f32.mrb[68].mxu0 }
 0x23b   : > { %v1907_v42 = vadd.f32 %v2733_v39, %v3915_v17  ;;  %v1898_v44 = vpop.f32.mrb[69].mxu0 }
 0x23c   : > { %v1899_v12 = vadd.f32 %v1898_v44, %v3911_v15  ;;  %1974 = vadd.xlane.f32.xlu0 %v3940_v21  ;;  %v2734_v22 = vpop.f32.mrb[70].mxu0 }
 0x23d   : > { %v1910_v34 = vadd.f32 %v2734_v22, %v3917_v0  ;;  %v1901_v4 = vpop.f32.mrb[71].mxu0  ;;  %v3955_v15 = vadd.f32 %v2604_v30, %v1907_v42 }
 0x23e   : > { %v1902_v31 = vadd.f32 %v1901_v4, %v3913_v60  ;;  %v3949_v35 = vadd.f32 %v2604_v30, %v1899_v12 }
 0x23f   : > { %v3961_v51 = vadd.f32 %v2604_v30, %v1910_v34 }
 0x240   : > { %1976 = vadd.xlane.f32.xlu0 %v3947_v2  ;;  %1978 = vadd.xlane.f32.xlu1 %v3949_v35  ;;  %v3953_v5 = vadd.f32 %v2604_v30, %v1902_v31 }
 0x242   : > { %v2737_v17 = vpop.f32.mrb[72].mxu0 }
 0x243   : > { %v1923_v41 = vadd.f32 %v2737_v17, %v1771_v16  ;;  %v1914_v50 = vpop.f32.mrb[73].mxu0 }
 0x244   : > { %v1915_v0 = vadd.f32 %v1914_v50, %v3919_v59  ;;  %1980 = vadd.xlane.f32.xlu0 %v3953_v5  ;;  %1982 = vadd.xlane.f32.xlu1 %v3955_v15  ;;  %v2738_v60 = vpop.f32.mrb[74].mxu0 }
 0x245   : > { %v1926_v61 = vadd.f32 %v2738_v60, %v1774_v43  ;;  %v1917_v33 = vpop.f32.mrb[75].mxu0  ;;  %v3969_v59 = vadd.f32 %v2604_v30, %v1923_v41 }
 0x246   : > { %v1918_v45 = vadd.f32 %v1917_v33, %v3921_v25  ;;  %v3963_v8 = vadd.f32 %v2604_v30, %v1915_v0 }
 0x247   : > { %v3975_v7 = vadd.f32 %v2604_v30, %v1926_v61 }
 0x248   : > { %1984 = vadd.xlane.f32.xlu0 %v3961_v51  ;;  %1986 = vadd.xlane.f32.xlu1 %v3963_v8  ;;  %v3967_v62 = vadd.f32 %v2604_v30, %v1918_v45 }
 0x24a   : > { %v2741_v16 = vpop.f32.mrb[76].mxu0 }
 0x24b   : > { %v1939_v47 = vadd.f32 %v2741_v16, %v1787_v9  ;;  %v1930_v11 = vpop.f32.mrb[77].mxu0 }
 0x24c   : > { %v1931_v43 = vadd.f32 %v1930_v11, %v3923_v36  ;;  %1988 = vadd.xlane.f32.xlu0 %v3967_v62  ;;  %1990 = vadd.xlane.f32.xlu1 %v3969_v59  ;;  %v2742_v25 = vpop.f32.mrb[78].mxu0 }
 0x24d   : > { %v1942_v27 = vadd.f32 %v2742_v25, %v1790_v46  ;;  %v1933_v13 = vpop.f32.mrb[79].mxu0  ;;  %v3983_v36 = vadd.f32 %v2604_v30, %v1939_v47 }
 0x24e   : > { %v1934_v40 = vadd.f32 %v1933_v13, %v3925_v52  ;;  %v3977_v58 = vadd.f32 %v2604_v30, %v1931_v43  ;;  %v2889_v52 = vld [vmem:[%s4242_s9 + $0x8] sm:$0xff]  }
 0x24f   : > { %v3987_v53 = vadd.f32 %v2604_v30, %v1942_v27  ;;  %2745 = vmatprep.subr.bf16.mxu1 %v2889_v52 }
 0x250   : > { %1992 = vadd.xlane.f32.xlu0 %v3975_v7  ;;  %1994 = vadd.xlane.f32.xlu1 %v3977_v58  ;;  %v3981_v48 = vadd.f32 %v2604_v30, %v1934_v40 }
 0x251   : > { %2746 = vmatpush3.bf16.msra.mxu1 %v2889_v52 }
 0x252   : > { %2747 = vmatprep.subr.bf16.mxu1 %v2890_v20 }
 0x254   : > { %1996 = vadd.xlane.f32.xlu0 %v3981_v48  ;;  %1998 = vadd.xlane.f32.xlu1 %v3983_v36 }
 0x255   : > { %2748 = vmatpush3.bf16.msra.mxu1 %v2890_v20 }
 0x256   : > { %2749 = vmatprep.subr.bf16.mxu1 %v2891_v3 }
 0x258   : > { %2000 = vadd.xlane.f32.xlu0 %v3987_v53 }
 0x259   : > { %2750 = vmatpush3.bf16.msra.mxu1 %v2891_v3 }
 0x25a   : > { %2751 = vmatprep.subr.bf16.mxu1 %v2892_v23 }
 0x25d   : > { %2752 = vmatpush3.bf16.msra.mxu1 %v2892_v23 }
 0x2c5   : > { %v1971_v26 = vpop.xlane.xlu0 %1970 }
 0x2c6   : > { %v2003_v55 = vmul.f32 0.0078125, %v1971_v26 }
 0x2c7   : > { %v1973_v14 = vpop.xlane.xlu1 %1972 }
 0x2c8   : > { %v4006_v37 = vsub.f32 %v3934_v24, %v2003_v55  ;;  %v2004_v57 = vmul.f32 0.0078125, %v1973_v14  ;;  %v2894_v14 = vld [vmem:[%s4242_s9 + $0x30] sm:$0xff]  }
 0x2c9   : > { %v1975_v9 = vpop.xlane.xlu0 %1974 }
 0x2ca   : > { %v4009_v1 = vsub.f32 %v3937_v49, %v2004_v57  ;;  %v2005_v29 = vmul.f32 0.0078125, %v1975_v9  ;;  %v2035_v46 = vmul.f32 %v4006_v37, %v4006_v37 }
 0x2cc   : > { %v4014_v56 = vsub.f32 %v3940_v21, %v2005_v29  ;;  %2051 = vadd.xlane.f32.xlu1 %v2035_v46  ;;  %v2036_v10 = vmul.f32 %v4009_v1, %v4009_v1 }
 0x2cd   : > { %v1979_v54 = vpop.xlane.xlu1 %1978  ;;  %v1977_v28 = vpop.xlane.xlu0 %1976 }
 0x2ce   : > { %v2007_v30 = vmul.f32 0.0078125, %v1979_v54  ;;  %v2006_v6 = vmul.f32 0.0078125, %v1977_v28  ;;  %2053 = vadd.xlane.f32.xlu0 %v2036_v10  ;;  %v2037_v18 = vmul.f32 %v4014_v56, %v4014_v56 }
 0x2d0   : > { %v4021_v19 = vsub.f32 %v3949_v35, %v2007_v30  ;;  %v4024_v38 = vsub.f32 %v3947_v2, %v2006_v6  ;;  %2055 = vadd.xlane.f32.xlu1 %v2037_v18 }
 0x2d1   : > { %v1983_v63 = vpop.xlane.xlu1 %1982  ;;  %v1981_v24 = vpop.xlane.xlu0 %1980 }
 0x2d2   : > { %v2009_v49 = vmul.f32 0.0078125, %v1983_v63  ;;  %v2008_v39 = vmul.f32 0.0078125, %v1981_v24  ;;  %v2039_v21 = vmul.f32 %v4021_v19, %v4021_v19  ;;  %v2038_v42 = vmul.f32 %v4024_v38, %v4024_v38 }
 0x2d4   : > { %v4031_v44 = vsub.f32 %v3955_v15, %v2009_v49  ;;  %v4034_v12 = vsub.f32 %v3953_v5, %v2008_v39  ;;  %2059 = vadd.xlane.f32.xlu1 %v2039_v21  ;;  %2057 = vadd.xlane.f32.xlu0 %v2038_v42 }
 0x2d5   : > { %v1987_v22 = vpop.xlane.xlu1 %1986  ;;  %v1985_v34 = vpop.xlane.xlu0 %1984 }
 0x2d6   : > { %v2011_v4 = vmul.f32 0.0078125, %v1987_v22  ;;  %v2010_v31 = vmul.f32 0.0078125, %v1985_v34  ;;  %v2041_v2 = vmul.f32 %v4031_v44, %v4031_v44  ;;  %v2040_v35 = vmul.f32 %v4034_v12, %v4034_v12 }
 0x2d8   : > { %v4041_v17 = vsub.f32 %v3963_v8, %v2011_v4  ;;  %v4044_v15 = vsub.f32 %v3961_v51, %v2010_v31  ;;  %2063 = vadd.xlane.f32.xlu1 %v2041_v2  ;;  %2061 = vadd.xlane.f32.xlu0 %v2040_v35  ;;  %v4097_v2 = vld [vmem:[%s4240_s7] ss:$0 sm:$0xff] }
 0x2d9   : > { %v1991_v5 = vpop.xlane.xlu1 %1990  ;;  %v1989_v41 = vpop.xlane.xlu0 %1988 }
 0x2da   : > { %v2013_v50 = vmul.f32 0.0078125, %v1991_v5  ;;  %v2012_v0 = vmul.f32 0.0078125, %v1989_v41  ;;  %v2043_v60 = vmul.f32 %v4041_v17, %v4041_v17  ;;  %v2042_v61 = vmul.f32 %v4044_v15, %v4044_v15 }
 0x2dc   : > { %v4051_v33 = vsub.f32 %v3969_v59, %v2013_v50  ;;  %v4054_v45 = vsub.f32 %v3967_v62, %v2012_v0  ;;  %2067 = vadd.xlane.f32.xlu1 %v2043_v60  ;;  %2065 = vadd.xlane.f32.xlu0 %v2042_v61 }
 0x2dd   : > { %v1995_v51 = vpop.xlane.xlu1 %1994  ;;  %v1993_v8 = vpop.xlane.xlu0 %1992 }
 0x2de   : > { %v2015_v16 = vmul.f32 0.0078125, %v1995_v51  ;;  %v2014_v47 = vmul.f32 0.0078125, %v1993_v8  ;;  %v2045_v11 = vmul.f32 %v4051_v33, %v4051_v33  ;;  %v2044_v43 = vmul.f32 %v4054_v45, %v4054_v45 }
 0x2e0   : > { %v4061_v25 = vsub.f32 %v3977_v58, %v2015_v16  ;;  %v4064_v59 = vsub.f32 %v3975_v7, %v2014_v47  ;;  %2071 = vadd.xlane.f32.xlu1 %v2045_v11  ;;  %2069 = vadd.xlane.f32.xlu0 %v2044_v43 }
 0x2e1   : > { %v1999_v62 = vpop.xlane.xlu1 %1998  ;;  %v1997_v27 = vpop.xlane.xlu0 %1996 }
 0x2e2   : > { %v2017_v13 = vmul.f32 0.0078125, %v1999_v62  ;;  %v2016_v40 = vmul.f32 0.0078125, %v1997_v27  ;;  %v2047_v32 = vmul.f32 %v4061_v25, %v4061_v25  ;;  %v2046_v52 = vmul.f32 %v4064_v59, %v4064_v59  ;;  %v4105_v62 = vld [vmem:[%s4241_s8] ss:$0 sm:$0xff] }
 0x2e4   : > { %v4071_v20 = vsub.f32 %v3983_v36, %v2017_v13  ;;  %v4074_v58 = vsub.f32 %v3981_v48, %v2016_v40  ;;  %2075 = vadd.xlane.f32.xlu1 %v2047_v32  ;;  %2073 = vadd.xlane.f32.xlu0 %v2046_v52  ;;  %v2893_v48 = vld [vmem:[%s4242_s9 + $0x28] sm:$0xff]  }
 0x2e5   : > { %v2001_v7 = vpop.xlane.xlu0 %2000  ;;  %2753 = vmatprep.subr.bf16.mxu1 %v2893_v48 }
 0x2e6   : > { %v2018_v3 = vmul.f32 0.0078125, %v2001_v7  ;;  %v2049_v23 = vmul.f32 %v4071_v20, %v4071_v20  ;;  %v2048_v26 = vmul.f32 %v4074_v58, %v4074_v58  ;;  %2754 = vmatpush3.bf16.msra.mxu1 %v2893_v48 }
 0x2e7   : > { %2755 = vmatprep.subr.bf16.mxu1 %v2894_v14 }
 0x2e8   : > { %v4081_v55 = vsub.f32 %v3987_v53, %v2018_v3  ;;  %2079 = vadd.xlane.f32.xlu1 %v2049_v23  ;;  %2077 = vadd.xlane.f32.xlu0 %v2048_v26  ;;  %v2895_v53 = vld [vmem:[%s4242_s9 + $0x38] sm:$0xff]  }
 0x2ea   : > { %v2050_v36 = vmul.f32 %v4081_v55, %v4081_v55  ;;  %2756 = vmatpush3.bf16.msra.mxu1 %v2894_v14 }
 0x2eb   : > { %2757 = vmatprep.subr.bf16.mxu1 %v2895_v53 }
 0x2ec   : > { %2081 = vadd.xlane.f32.xlu0 %v2050_v36 }
 0x2ee   : > { %2758 = vmatpush3.bf16.msra.mxu1 %v2895_v53 }
 0x359   : > { %v2052_v57 = vpop.xlane.xlu1 %2051 }
 0x35a   : > { %v2083_v9 = vmul.f32 0.0078125, %v2052_v57 }
 0x35b   : > { %v2054_v29 = vpop.xlane.xlu0 %2053 }
 0x35c   : > { %v2099_v46 = vadd.f32 1e-05, %v2083_v9  ;;  %v2084_v10 = vmul.f32 0.0078125, %v2054_v29 }
 0x35d   : > { %v2056_v54 = vpop.xlane.xlu1 %2055 }
 0x35e   : > { %3024 = vrsqrt.f32 %v2099_v46  ;;  %v2100_v28 = vadd.f32 1e-05, %v2084_v10  ;;  %v2085_v30 = vmul.f32 0.0078125, %v2056_v54 }
 0x360   : > { %3026 = vrsqrt.f32 %v2100_v28  ;;  %v2101_v6 = vadd.f32 1e-05, %v2085_v30 }
 0x361   : > { %v2060_v18 = vpop.xlane.xlu1 %2059  ;;  %v2058_v63 = vpop.xlane.xlu0 %2057 }
 0x362   : > { %3028 = vrsqrt.f32 %v2101_v6  ;;  %v2087_v24 = vmul.f32 0.0078125, %v2060_v18  ;;  %v2086_v49 = vmul.f32 0.0078125, %v2058_v63 }
 0x364   : > { %v2103_v39 = vadd.f32 1e-05, %v2087_v24  ;;  %v2102_v21 = vadd.f32 1e-05, %v2086_v49 }
 0x365   : > { %v2064_v42 = vpop.xlane.xlu1 %2063  ;;  %v2062_v22 = vpop.xlane.xlu0 %2061 }
 0x366   : > { %3030 = vrsqrt.f32 %v2103_v39  ;;  %v2089_v34 = vmul.f32 0.0078125, %v2064_v42  ;;  %v2088_v4 = vmul.f32 0.0078125, %v2062_v22 }
 0x367   : > { %3032 = vrsqrt.f32 %v2102_v21 }
 0x368   : > { %v3025_v31 = vpop.eup %3024  ;;  %v2105_v35 = vadd.f32 1e-05, %v2089_v34  ;;  %v2104_v5 = vadd.f32 1e-05, %v2088_v4 }
 0x369   : > { %v2068_v41 = vpop.xlane.xlu1 %2067  ;;  %v2066_v50 = vpop.xlane.xlu0 %2065  ;;  %v2131_v0 = vmul.f32 %v3025_v31, %v4006_v37 }
 0x36a   : > { %v3027_v60 = vpop.eup %3026  ;;  %3034 = vrsqrt.f32 %v2105_v35  ;;  %v2091_v61 = vmul.f32 0.0078125, %v2068_v41  ;;  %v2090_v51 = vmul.f32 0.0078125, %v2066_v50 }
 0x36b   : > { %3036 = vrsqrt.f32 %v2104_v5  ;;  %v2132_v8 = vmul.f32 %v3027_v60, %v4009_v1  ;;  %v2153_v16 = vmul.f32 %v4097_v2, %v2131_v0 }
 0x36c   : > { %v3029_v47 = vpop.eup %3028  ;;  %v2107_v11 = vadd.f32 1e-05, %v2091_v61  ;;  %v2106_v43 = vadd.f32 1e-05, %v2090_v51 }
 0x36d   : > { %v2133_v27 = vmul.f32 %v3029_v47, %v4014_v56  ;;  %v2072_v37 = vpop.xlane.xlu1 %2071  ;;  %v2070_v13 = vpop.xlane.xlu0 %2069  ;;  %v2154_v40 = vmul.f32 %v4097_v2, %v2132_v8  ;;  %v2175_v1 = vadd.f32 %v4105_v62, %v2153_v16 }
 0x36e   : > { %3038 = vrsqrt.f32 %v2107_v11  ;;  %v2093_v32 = vmul.f32 0.0078125, %v2072_v37  ;;  %v2092_v52 = vmul.f32 0.0078125, %v2070_v13 }
 0x36f   : > { %3040 = vrsqrt.f32 %v2106_v43  ;;  %v2176_v7 = vadd.f32 %v4105_v62, %v2154_v40  ;;  %v2155_v48 = vmul.f32 %v4097_v2, %v2133_v27 }
 0x370   : > { %v3031_v3 = vpop.eup %3030  ;;  %v2109_v23 = vadd.f32 1e-05, %v2093_v32  ;;  %v2108_v26 = vadd.f32 1e-05, %v2092_v52 }
 0x371   : > { %v3033_v36 = vpop.eup %3032  ;;  %v2076_v14 = vpop.xlane.xlu1 %2075  ;;  %v2207_v53 = vpack.c.bf16 %v2176_v7, %v2175_v1  ;;  %v2135_v46 = vmul.f32 %v3031_v3, %v4021_v19  ;;  %v2177_v24 = vadd.f32 %v4105_v62, %v2155_v48 }
 0x372   : > { %v2074_v56 = vpop.xlane.xlu0 %2073  ;;  %v2134_v57 = vmul.f32 %v3033_v36, %v4024_v38  ;;  %3042 = vrsqrt.f32 %v2109_v23  ;;  %v2095_v9 = vmul.f32 0.0078125, %v2076_v14 }
 0x373   : > { %v2094_v29 = vmul.f32 0.0078125, %v2074_v56  ;;  %3044 = vrsqrt.f32 %v2108_v26  ;;  %2759 = vmatprep.mubr.bf16.mxu1 %v2207_v53  ;;  %v2157_v42 = vmul.f32 %v4097_v2, %v2135_v46 }
 0x374   : > { %v3035_v10 = vpop.eup %3034  ;;  %v2156_v54 = vmul.f32 %v4097_v2, %v2134_v57  ;;  %v2111_v28 = vadd.f32 1e-05, %v2095_v9 }
 0x375   : > { %v2110_v30 = vadd.f32 1e-05, %v2094_v29  ;;  %v3037_v6 = vpop.eup %3036  ;;  %v2080_v18 = vpop.xlane.xlu1 %2079  ;;  %v2137_v49 = vmul.f32 %v3035_v10, %v4031_v44 }
 0x376   : > { %v2078_v63 = vpop.xlane.xlu0 %2077  ;;  %3046 = vrsqrt.f32 %v2111_v28  ;;  %v2097_v38 = vmul.f32 0.0078125, %v2080_v18  ;;  %v2178_v21 = vadd.f32 %v4105_v62, %v2156_v54  ;;  %v2136_v19 = vmul.f32 %v3037_v6, %v4034_v12 }
 0x377   : > { %v2096_v39 = vmul.f32 0.0078125, %v2078_v63  ;;  %3048 = vrsqrt.f32 %v2110_v30  ;;  %v2159_v44 = vmul.f32 %v4097_v2, %v2137_v49  ;;  %v2179_v12 = vadd.f32 %v4105_v62, %v2157_v42 }
 0x378   : > { %v3039_v22 = vpop.eup %3038  ;;  %v2113_v34 = vadd.f32 1e-05, %v2097_v38  ;;  %v2208_v31 = vpack.c.bf16 %v2178_v21, %v2177_v24  ;;  %v2158_v41 = vmul.f32 %v4097_v2, %v2136_v19 }
 0x379   : > { %v2112_v4 = vadd.f32 1e-05, %v2096_v39  ;;  %v3041_v35 = vpop.eup %3040  ;;  %v2139_v50 = vmul.f32 %v3039_v22, %v4041_v17  ;;  %v2181_v43 = vadd.f32 %v4105_v62, %v2159_v44 }
 0x37a   : > { %v2082_v5 = vpop.xlane.xlu0 %2081  ;;  %3050 = vrsqrt.f32 %v2113_v34  ;;  %2760 = vmatmul.mubr.bf16.vlgmr.msra.gmra.mrb[64].mxu1 %v2208_v31  ;;  %v2138_v60 = vmul.f32 %v3041_v35, %v4044_v15  ;;  %v2180_v61 = vadd.f32 %v4105_v62, %v2158_v41 }
 0x37b   : > { %v2098_v0 = vmul.f32 0.0078125, %v2082_v5  ;;  %3052 = vrsqrt.f32 %v2112_v4  ;;  %v2161_v17 = vmul.f32 %v4097_v2, %v2139_v50 }
 0x37c   : > { %v3043_v51 = vpop.eup %3042  ;;  %v2160_v16 = vmul.f32 %v4097_v2, %v2138_v60  ;;  %v2209_v11 = vpack.c.bf16 %v2180_v61, %v2179_v12 }
 0x37d   : > { %v2114_v8 = vadd.f32 1e-05, %v2098_v0  ;;  %v3045_v47 = vpop.eup %3044  ;;  %v2141_v37 = vmul.f32 %v3043_v51, %v4051_v33  ;;  %v2183_v1 = vadd.f32 %v4105_v62, %v2161_v17 }
 0x37e   : > { %v2182_v27 = vadd.f32 %v4105_v62, %v2160_v16  ;;  %v2140_v15 = vmul.f32 %v3045_v47, %v4054_v45  ;;  %2763 = vmatprep.mubr.bf16.mxu1 %v2209_v11 }
 0x37f   : > { %3054 = vrsqrt.f32 %v2114_v8  ;;  %v2163_v23 = vmul.f32 %v4097_v2, %v2141_v37 }
 0x380   : > { %v3047_v13 = vpop.eup %3046  ;;  %v2210_v40 = vpack.c.bf16 %v2182_v27, %v2181_v43  ;;  %v2162_v32 = vmul.f32 %v4097_v2, %v2140_v15 }
 0x381   : > { %v3049_v52 = vpop.eup %3048  ;;  %v2143_v26 = vmul.f32 %v3047_v13, %v4061_v25  ;;  %v2185_v56 = vadd.f32 %v4105_v62, %v2163_v23 }
 0x382   : > { %2764 = vmatmul.mubr.bf16.gmra.mrb[68].mxu1 %v2210_v40  ;;  %v2184_v7 = vadd.f32 %v4105_v62, %v2162_v32  ;;  %v2142_v3 = vmul.f32 %v3049_v52, %v4064_v59 }
 0x383   : > { %v2165_v59 = vmul.f32 %v4097_v2, %v2143_v26 }
 0x384   : > { %v3051_v45 = vpop.eup %3050  ;;  %v2211_v36 = vpack.c.bf16 %v2184_v7, %v2183_v1  ;;  %v2164_v33 = vmul.f32 %v4097_v2, %v2142_v3 }
 0x385   : > { %v3053_v48 = vpop.eup %3052  ;;  %v2145_v14 = vmul.f32 %v3051_v45, %v4071_v20  ;;  %v2187_v20 = vadd.f32 %v4105_v62, %v2165_v59 }
 0x386   : > { %2767 = vmatprep.mubr.bf16.mxu1 %v2211_v36  ;;  %v2186_v53 = vadd.f32 %v4105_v62, %v2164_v33  ;;  %v2144_v57 = vmul.f32 %v3053_v48, %v4074_v58 }
 0x387   : > { %v2167_v10 = vmul.f32 %v4097_v2, %v2145_v14 }
 0x388   : > { %v2212_v25 = vpack.c.bf16 %v2186_v53, %v2185_v56  ;;  %v2166_v29 = vmul.f32 %v4097_v2, %v2144_v57 }
 0x389   : > { %v3055_v9 = vpop.eup %3054  ;;  %v2189_v30 = vadd.f32 %v4105_v62, %v2167_v10 }
 0x38a   : > { %v2146_v46 = vmul.f32 %v3055_v9, %v4081_v55  ;;  %2768 = vmatmul.mubr.bf16.gmra.mrb[72].mxu1 %v2212_v25  ;;  %v2188_v54 = vadd.f32 %v4105_v62, %v2166_v29  ;;  %v2607_v55 = vld [vmem:[%s4243_s10] ss:$0 sm:$0xff] }
 0x38c   : > { %v2168_v28 = vmul.f32 %v4097_v2, %v2146_v46  ;;  %v2213_v58 = vpack.c.bf16 %v2188_v54, %v2187_v20 }
 0x38e   : > { %v2190_v6 = vadd.f32 %v4105_v62, %v2168_v28  ;;  %2771 = vmatprep.mubr.bf16.mxu1 %v2213_v58 }
 0x390   : > { %v2214_v18 = vpack.c.bf16 %v2190_v6, %v2189_v30 }
 0x392   : > { %2772 = vmatmul.mubr.bf16.gmra.mrb[76].mxu1 %v2214_v18 }
 0x44d   : > { %v2761_v63 = vpop.f32.mrb[64].mxu1 }
 0x44e   : > { %v2313_v24 = vadd.f32 %v2761_v63, %v2607_v55  ;;  %v2304_v49 = vpop.f32.mrb[65].mxu1 }
 0x44f   : > { %v2305_v38 = vadd.f32 %v2607_v55, %v2304_v49  ;;  %v2762_v2 = vpop.f32.mrb[66].mxu1 }
 0x450   : > { %2369 = vst [vmem:[%s4158_s13 + $0x10] sm:$0xff] %v2313_v24  ;;  %v2316_v62 = vadd.f32 %v2762_v2, %v2607_v55  ;;  %v2307_v39 = vpop.f32.mrb[67].mxu1 }
 0x451   : > { %2367 = vst [vmem:[%s4158_s13] sm:$0xff] %v2305_v38  ;;  %v2308_v21 = vadd.f32 %v2607_v55, %v2307_v39 }
 0x452   : > { %2370 = vst [vmem:[%s4158_s13 + $0x18] sm:$0xff] %v2316_v62 }
 0x453   : > { %2368 = vst [vmem:[%s4158_s13 + $0x8] sm:$0xff] %v2308_v21 }
 0x455   : > { %v2765_v19 = vpop.f32.mrb[68].mxu1 }
 0x456   : > { %v2329_v42 = vadd.f32 %v2765_v19, %v2607_v55  ;;  %v2320_v22 = vpop.f32.mrb[69].mxu1 }
 0x457   : > { %v2321_v34 = vadd.f32 %v2607_v55, %v2320_v22  ;;  %v2766_v4 = vpop.f32.mrb[70].mxu1 }
 0x458   : > { %2373 = vst [vmem:[%s4158_s13 + $0x30] sm:$0xff] %v2329_v42  ;;  %v2332_v31 = vadd.f32 %v2766_v4, %v2607_v55  ;;  %v2323_v35 = vpop.f32.mrb[71].mxu1 }
 0x459   : > { %2371 = vst [vmem:[%s4158_s13 + $0x20] sm:$0xff] %v2321_v34  ;;  %v2324_v5 = vadd.f32 %v2607_v55, %v2323_v35 }
 0x45a   : > { %2374 = vst [vmem:[%s4158_s13 + $0x38] sm:$0xff] %v2332_v31 }
 0x45b   : > { %2372 = vst [vmem:[%s4158_s13 + $0x28] sm:$0xff] %v2324_v5 }
 0x45d   : > { %v2769_v41 = vpop.f32.mrb[72].mxu1 }
 0x45e   : > { %v2345_v44 = vadd.f32 %v2769_v41, %v2607_v55  ;;  %v2336_v50 = vpop.f32.mrb[73].mxu1 }
 0x45f   : > { %v2337_v0 = vadd.f32 %v2607_v55, %v2336_v50  ;;  %v2770_v60 = vpop.f32.mrb[74].mxu1 }
 0x460   : > { %2377 = vst [vmem:[%s4158_s13 + $0x50] sm:$0xff] %v2345_v44  ;;  %v2348_v12 = vadd.f32 %v2770_v60, %v2607_v55  ;;  %v2339_v61 = vpop.f32.mrb[75].mxu1 }
 0x461   : > { %2375 = vst [vmem:[%s4158_s13 + $0x40] sm:$0xff] %v2337_v0  ;;  %v2340_v51 = vadd.f32 %v2607_v55, %v2339_v61 }
 0x462   : > { %2378 = vst [vmem:[%s4158_s13 + $0x58] sm:$0xff] %v2348_v12 }
 0x463   : > { %2376 = vst [vmem:[%s4158_s13 + $0x48] sm:$0xff] %v2340_v51 }
 0x465   : > { %v2773_v8 = vpop.f32.mrb[76].mxu1 }
 0x466   : > { %v2361_v16 = vadd.f32 %v2773_v8, %v2607_v55  ;;  %v2352_v47 = vpop.f32.mrb[77].mxu1 }
 0x467   : > { %v2353_v11 = vadd.f32 %v2607_v55, %v2352_v47  ;;  %v2774_v43 = vpop.f32.mrb[78].mxu1 }
 0x468   : > { %2381 = vst [vmem:[%s4158_s13 + $0x70] sm:$0xff] %v2361_v16  ;;  %v2364_v17 = vadd.f32 %v2774_v43, %v2607_v55  ;;  %v2355_v27 = vpop.f32.mrb[79].mxu1 }
 0x469   : > { %2379 = vst [vmem:[%s4158_s13 + $0x60] sm:$0xff] %v2353_v11  ;;  %v2356_v15 = vadd.f32 %v2607_v55, %v2355_v27 }
 0x46a   : > { %2382 = vst [vmem:[%s4158_s13 + $0x78] sm:$0xff] %v2364_v17 }
 0x46b   : > { %2380 = vst [vmem:[%s4158_s13 + $0x68] sm:$0xff] %v2356_v15 }
 0x46c   : > { %3069 = shalt.err (!%p3066_p5)
}
 0x46d   : > { %s3070_s14 = scalar_lea.hbm %s4178_s23, 2048  ;;  %s3074_s16 = scalar_lea.hbm %s4244_s11, 4096 }
 0x46e   : > { %p3071_p6 = scmp.ne.s32.totalorder %s4178_s23, %s3070_s14  ;;  %p3075_p10 = scmp.lt.u32.totalorder %s4178_s23, %s4244_s11 }
 0x46f   : > { %p3076_p11 = scmp.lt.u32.totalorder %s3074_s16, %s3070_s14  ;;  %p3078_p13 = scmp.lt.u32.totalorder %s3070_s14, %s4178_s23 }
 0x470   : > { %p3072_p7 = pnand %p3071_p6, %p3242_p4 }
 0x471   : > { %p3077_p12 = por %p3076_p11, %p3075_p10 }
 0x472   : > { %p3073_p9 = pneg %p3072_p7 }
 0x473   : > { %p3079_p0 = por %p3078_p13, %p3077_p12 }
 0x475   : > { %p3080_p1 = pnand %p3079_p0, %p3073_p9 }
 0x477   : > { %3083 = shalt.err (!%p3080_p1)
}
 0x478   : > { %s3140_s26 = smov 128   ;;  %s3141_s21 = smov 8  }
 0x479   : > { %2796 = dma.vmem_to_hbm [thread:$0]  (%p3242_p4), %s4180_s25, 2048, %s4178_s23, %s4187_s20, %s3140_s26, %s3140_s26, %s3141_s21  }
 0x47a PF: > { %p2802_p2 = scmp.ge.s32.totalorder %s3134_s22, 2  ;;  %s2414_s28 = sand.u32 1, %s3114_s17  }
 0x47b   : > { %s2415_s14 = scalar_lea.sflag [#allocation3], %s2414_s28 }
 0x47c   : > { %p2799_p3 = pnand %p2802_p2, %p3249_p8 }
 0x47e   : > { %3109 = dma.done.wait (!%p2799_p3), %s2415_s14, 2048  }
 0x47f   : > { %3111 = vsyncadd (!%p2799_p3), %s2415_s14, 4294965248  ;;  %s24_s22 = sadd.s32 1, %s3134_s22   ;;  %s4253_s20 = sld [smem:[#allocation5_spill]] }
 0x480   : > { %p21_p5 = scmp.ge.s32.totalorder %s24_s22, 4   ;;  %s4254_s21 = sld [smem:[#allocation6_spill]] }
 0x481   : > { %s4255_s17 = smov %s3118_s18  ;;  %s4256_s18 = smov %s3122_s19 }
 0x482   : > { %s4257_s19 = smov %s3255_s30  ;;  %23 = sbr.rel (!%p21_p5) target bundleno = 4 (0x4), region = 102 }
 0x489   :  { %2420 = vsyncpa [#allocation3], 1 }
 0x48a   :  { %2422 = vsyncpa [#allocation3 + $0x1], 1 }

</bundles_post_ra>
